<compile_context>
chip_gen: v5e
topology: v5e:2x2
jax: 0.10.0
libtpu: 0.0.40
codegen_flags: <defaults>
</compile_context>

<pallas_src>
import functools

import jax
import jax.numpy as jnp
from jax.experimental import pallas as pl
from jax.experimental.pallas import tpu as pltpu


def _round_up(x, m):
    return (x + m - 1) // m * m


def _bottleneck_kernel(*refs, SH, W, Wrow, OFF, has_proj):
    if has_proj:
        (xs_ref, xlo_ref, xhi_ref, w1_ref, s1_ref, b1_ref,
         w2_ref, s2_ref, b2_ref, w3_ref, s3_ref, b3_ref,
         wsc_ref, ssc_ref, bsc_ref, out_ref, g_ref) = refs
    else:
        (xs_ref, xlo_ref, xhi_ref, w1_ref, s1_ref, b1_ref,
         w2_ref, s2_ref, b2_ref, w3_ref, s3_ref, b3_ref,
         out_ref, g_ref) = refs

    s = pl.program_id(1)
    n_strips = pl.num_programs(1)
    L = SH * Wrow
    bf16 = jnp.bfloat16

    # ---------------------------------------------------------------- zero fill
    # The scratch is small (per strip); one full zero store guarantees the pitch /
    # halo columns, lead-in rows and image-border halo rows are exact zeros every
    # step, keeping both grid axes "parallel" and megacore-safe.
    g_ref[...] = jnp.zeros(g_ref.shape, g_ref.dtype)

    # ----------------------------------------------- conv1 (1x1) + bn1 + relu
    def conv1(v):                                    # v: (rows, Cin) bf16
        h = jnp.dot(v, w1_ref[...], preferred_element_type=jnp.float32)
        return jnp.maximum(h * s1_ref[...] + b1_ref[...], 0.0)

    h1 = conv1(xs_ref[0])                            # (SH*W, P_p) f32
    # pitch-W -> pitch-Wrow staging; every destination start is sublane-aligned.
    for i in range(SH):
        dst = OFF + (i + 1) * Wrow
        g_ref[dst:dst + W, :] = h1[i * W:(i + 1) * W, :]

    # one-row h1 halos recomputed from the neighbouring strips (zero at the border)
    h_lo = conv1(xlo_ref[0]) * jnp.where(s > 0, 1.0, 0.0)
    g_ref[OFF:OFF + W, :] = h_lo
    h_hi = conv1(xhi_ref[0]) * jnp.where(s < n_strips - 1, 1.0, 0.0)
    dst = OFF + (SH + 1) * Wrow
    g_ref[dst:dst + W, :] = h_hi

    # ------------------------------------ conv2 (3x3, K-stacked) + bn2 + relu
    def tap(kh, kw):                                 # contiguous flat window
        start = OFF + kh * Wrow + kw - 1
        return g_ref[start:start + L, :].astype(bf16)

    acc = None
    for kw in range(3):
        lhs = jnp.concatenate([tap(kh, kw) for kh in range(3)], axis=1)  # (L, 3*P_p)
        part = jnp.dot(lhs, w2_ref[kw], preferred_element_type=jnp.float32)
        acc = part if acc is None else acc + part

    # compact pitch-Wrow rows back to pitch-W (aligned slices), bn2 + relu
    acc_c = jnp.concatenate(
        [acc[i * Wrow:i * Wrow + W, :] for i in range(SH)], axis=0)      # (SH*W, P_p)
    h2 = jnp.maximum(acc_c * s2_ref[...] + b2_ref[...], 0.0).astype(bf16)

    # ------------------------------ conv3 (1x1) + bn3 + shortcut + final relu
    h3 = jnp.dot(h2, w3_ref[...], preferred_element_type=jnp.float32)
    h3 = h3 * s3_ref[...] + b3_ref[...]
    if has_proj:
        sc = jnp.dot(xs_ref[0], wsc_ref[...], preferred_element_type=jnp.float32)
        sc = sc * ssc_ref[...] + bsc_ref[...]
    else:
        sc = xs_ref[0].astype(jnp.float32)           # identity: Cin == Cout
    out_ref[0] = jnp.maximum(h3 + sc, 0.0).astype(out_ref.dtype)


def bottleneck_forward(x, params, *, stride=1, strip_rows=8):
    # TODO(synk): stride > 1 (strided conv2 / strided shortcut) not implemented.
    assert stride == 1, "only stride=1 supported in this kernel"
    N, H, W, Cin = x.shape
    P = params["w1"].shape[1]
    Cout = 4 * P
    has_proj = "wsc" in params
    if not has_proj:
        assert Cin == Cout, "identity shortcut requires in_planes == 4*planes"
    assert W % 8 == 0, "W must be a multiple of 8"

    LANE = 128
    P_p = _round_up(P, LANE)
    SH = strip_rows if H % strip_rows == 0 else H     # rows per H-strip
    S = H // SH
    Wrow = _round_up(W + 1, 8)      # pitched row stride: >=1 zero column between rows
    OFF = 8                         # zero lead-in so the (kh=0, kw=0) window is in bounds
    TOT = _round_up(OFF + (SH + 2) * Wrow + 1, 8)

    bf16 = jnp.bfloat16

    # ---- HBM boundary: bf16 activations, free reshapes, no pad / slice passes ----
    x_flat = x.astype(bf16).reshape(N, H * W, Cin)

    def padw(w, r, c):              # zero-pad 2-D weight to (r, c), cast to bf16
        return jnp.pad(w, ((0, r - w.shape[0]), (0, c - w.shape[1]))).astype(bf16)

    def padv(v, c):                 # zero-pad (1, C) folded-BN scale / bias (f32)
        return jnp.pad(v, ((0, 0), (0, c - v.shape[1]))).astype(jnp.float32)

    w1 = padw(params["w1"], Cin, P_p)
    s1, b1 = padv(params["s1"], P_p), padv(params["b1"], P_p)
    # conv2 weights: (3, 3, P, P) HWIO -> per-kw K-stacked (3, 3*P_p, P_p)
    w2p = jnp.pad(params["w2"], ((0, 0), (0, 0), (0, P_p - P), (0, P_p - P)))
    w2s = jnp.stack(
        [jnp.concatenate([w2p[kh, kw] for kh in range(3)], axis=0) for kw in range(3)],
        axis=0).astype(bf16)
    s2, b2 = padv(params["s2"], P_p), padv(params["b2"], P_p)
    w3 = padw(params["w3"], P_p, Cout)
    s3 = params["s3"].astype(jnp.float32)
    b3 = params["b3"].astype(jnp.float32)

    inputs = [x_flat, x_flat, x_flat, w1, s1, b1, w2s, s2, b2, w3, s3, b3]
    if has_proj:
        inputs += [params["wsc"].astype(bf16),
                   params["ssc"].astype(jnp.float32),
                   params["bsc"].astype(jnp.float32)]

    def const(shape):
        nd = len(shape)
        return pl.BlockSpec(shape, lambda n, s: (0,) * nd)

    in_specs = [
        pl.BlockSpec((1, SH * W, Cin), lambda n, s: (n, s, 0)),
        # one-row halo fetches (index clamped at the image border; zeroed in-kernel)
        pl.BlockSpec((1, W, Cin), lambda n, s: (n, jnp.maximum(s * SH - 1, 0), 0)),
        pl.BlockSpec((1, W, Cin), lambda n, s: (n, jnp.minimum(s * SH + SH, H - 1), 0)),
        const((Cin, P_p)), const((1, P_p)), const((1, P_p)),
        const((3, 3 * P_p, P_p)), const((1, P_p)), const((1, P_p)),
        const((P_p, Cout)), const((1, Cout)), const((1, Cout)),
    ]
    if has_proj:
        in_specs += [const((Cin, Cout)), const((1, Cout)), const((1, Cout))]

    kernel = functools.partial(_bottleneck_kernel, SH=SH, W=W, Wrow=Wrow, OFF=OFF,
                               has_proj=has_proj)

    # per-step VMEM estimate: double-buffered activation/weight blocks + scratch + temps
    blk = 2 * 2 * (SH * W * Cin + 2 * W * Cin + SH * W * Cout)
    wts = 2 * 2 * (Cin * P_p + 9 * P_p * P_p + P_p * Cout
                   + (Cin * Cout if has_proj else 0)) + 2 * 4 * 6 * P_p
    tmp = (4 * SH * Wrow * 4 * P_p + 2 * 3 * SH * Wrow * 3 * P_p
           + 4 * SH * W * P_p + 4 * TOT * P_p)
    vmem_limit = int(min(max(blk + wts + tmp + (8 << 20), 32 << 20), 56 << 20))

    grid_spec = pltpu.PrefetchScalarGridSpec(
        num_scalar_prefetch=0,
        grid=(N, S),
        in_specs=in_specs,
        out_specs=pl.BlockSpec((1, SH * W, Cout), lambda n, s: (n, s, 0)),
        scratch_shapes=[pltpu.VMEM((TOT, P_p), jnp.float32)],
    )

    out_flat = pl.pallas_call(
        kernel,
        out_shape=jax.ShapeDtypeStruct((N, H * W, Cout), bf16),
        grid_spec=grid_spec,
        compiler_params=pltpu.CompilerParams(
            dimension_semantics=("parallel", "parallel"),
            vmem_limit_bytes=vmem_limit),
    )(*inputs)

    # free (bitcast) reshape — no HBM slice / copy pass
    return out_flat.reshape(N, H, W, Cout)


# ----------------------- parameters & pure-JAX reference -----------------------

def _bn_fold(key, c, eps=1e-5):
    kg, kb, km, kv = jax.random.split(key, 4)
    gamma = 1.0 + 0.1 * jax.random.normal(kg, (c,), jnp.float32)
    beta = 0.1 * jax.random.normal(kb, (c,), jnp.float32)
    mean = 0.1 * jax.random.normal(km, (c,), jnp.float32)
    var = jnp.abs(jax.random.normal(kv, (c,), jnp.float32)) + 0.5
    scale = gamma / jnp.sqrt(var + eps)
    bias = beta - mean * scale
    return scale.reshape(1, c), bias.reshape(1, c)


def init_params(key, in_planes, planes, stride=1):
    exp = 4
    ks = jax.random.split(key, 8)

    def conv_w(k, shape, fan_in):
        return jax.random.normal(k, shape, jnp.float32) / jnp.sqrt(float(fan_in))

    p = {}
    p["w1"] = conv_w(ks[0], (in_planes, planes), in_planes)
    p["s1"], p["b1"] = _bn_fold(ks[1], planes)
    p["w2"] = conv_w(ks[2], (3, 3, planes, planes), 9 * planes)
    p["s2"], p["b2"] = _bn_fold(ks[3], planes)
    p["w3"] = conv_w(ks[4], (planes, exp * planes), planes)
    p["s3"], p["b3"] = _bn_fold(ks[5], exp * planes)
    if stride != 1 or in_planes != exp * planes:
        p["wsc"] = conv_w(ks[6], (in_planes, exp * planes), in_planes)
        p["ssc"], p["bsc"] = _bn_fold(ks[7], exp * planes)
    return p


def reference(x, params):
    hp = jax.lax.Precision.HIGHEST

    def conv1x1(h, w):
        return jnp.einsum("nhwc,cd->nhwd", h, w, precision=hp)

    def bn(h, s, b):
        return h * s.reshape(1, 1, 1, -1) + b.reshape(1, 1, 1, -1)

    h = jax.nn.relu(bn(conv1x1(x, params["w1"]), params["s1"], params["b1"]))
    h = jax.lax.conv_general_dilated(
        h, params["w2"], window_strides=(1, 1), padding="SAME",
        dimension_numbers=("NHWC", "HWIO", "NHWC"), precision=hp)
    h = jax.nn.relu(bn(h, params["s2"], params["b2"]))
    h = bn(conv1x1(h, params["w3"]), params["s3"], params["b3"])
    if "wsc" in params:
        sc = bn(conv1x1(x, params["wsc"]), params["ssc"], params["bsc"])
    else:
        sc = x
    return jax.nn.relu(h + sc)


if __name__ == "__main__":
    key = jax.random.PRNGKey(0)
    N, H, W = 2, 16, 16

    # case 1: projection shortcut (in_planes != 4 * planes)
    # case 2: identity shortcut  (in_planes == 4 * planes) -> no wsc matmul in kernel
    cases = [(8, 4), (16, 4)]
    for in_planes, planes in cases:
        kx, kp, key = jax.random.split(key, 3)
        x = jax.random.normal(kx, (N, H, W, in_planes), jnp.float32)
        params = init_params(kp, in_planes, planes, stride=1)

        out = jax.block_until_ready(bottleneck_forward(x, params, stride=1))
        ref = reference(x, params)

        assert out.shape == (N, H, W, 4 * planes)
        out32 = out.astype(jnp.float32)
        max_diff = float(jnp.max(jnp.abs(out32 - ref)))
        assert jnp.allclose(out32, ref, atol=5e-2, rtol=5e-2), (in_planes, planes, max_diff)

    print("KERNEL_OK")
</pallas_src>

<mosaic_0001>
module attributes {stable_mosaic.version = 11 : i64} {
  func.func @_bottleneck_kernel(%arg0: i32, %arg1: i32, %arg2: memref<1x128x8xbf16, #tpu.memory_space<vmem>>, %arg3: memref<1x16x8xbf16, #tpu.memory_space<vmem>>, %arg4: memref<1x16x8xbf16, #tpu.memory_space<vmem>>, %arg5: memref<8x128xbf16, #tpu.memory_space<vmem>>, %arg6: memref<1x128xf32, #tpu.memory_space<vmem>>, %arg7: memref<1x128xf32, #tpu.memory_space<vmem>>, %arg8: memref<3x384x128xbf16, #tpu.memory_space<vmem>>, %arg9: memref<1x128xf32, #tpu.memory_space<vmem>>, %arg10: memref<1x128xf32, #tpu.memory_space<vmem>>, %arg11: memref<128x16xbf16, #tpu.memory_space<vmem>>, %arg12: memref<1x16xf32, #tpu.memory_space<vmem>>, %arg13: memref<1x16xf32, #tpu.memory_space<vmem>>, %arg14: memref<8x16xbf16, #tpu.memory_space<vmem>>, %arg15: memref<1x16xf32, #tpu.memory_space<vmem>>, %arg16: memref<1x16xf32, #tpu.memory_space<vmem>>, %arg17: memref<1x128x16xbf16, #tpu.memory_space<vmem>>, %arg18: memref<256x128xf32, #tpu.memory_space<vmem>>) attributes {dimension_semantics = [#tpu.dimension_semantics<parallel>, #tpu.dimension_semantics<parallel>], iteration_bounds = array<i64: 2, 2>, scalar_prefetch = 0 : i64, scratch_operands = 1 : i64, tpu.core_type = #tpu.core_type<tc>, window_params = [{transform_indices = @transform_0, window_bounds = array<i64: 1, 128, 8>}, {transform_indices = @transform_1, window_bounds = array<i64: 1, 16, 8>}, {transform_indices = @transform_2, window_bounds = array<i64: 1, 16, 8>}, {pipeline_mode = #tpu.pipeline_mode<synchronous>, transform_indices = @transform_3, window_bounds = array<i64: 8, 128>}, {pipeline_mode = #tpu.pipeline_mode<synchronous>, transform_indices = @transform_4, window_bounds = array<i64: 1, 128>}, {pipeline_mode = #tpu.pipeline_mode<synchronous>, transform_indices = @transform_5, window_bounds = array<i64: 1, 128>}, {pipeline_mode = #tpu.pipeline_mode<synchronous>, transform_indices = @transform_6, window_bounds = array<i64: 3, 384, 128>}, {pipeline_mode = #tpu.pipeline_mode<synchronous>, transform_indices = @transform_7, window_bounds = array<i64: 1, 128>}, {pipeline_mode = #tpu.pipeline_mode<synchronous>, transform_indices = @transform_8, window_bounds = array<i64: 1, 128>}, {pipeline_mode = #tpu.pipeline_mode<synchronous>, transform_indices = @transform_9, window_bounds = array<i64: 128, 16>}, {pipeline_mode = #tpu.pipeline_mode<synchronous>, transform_indices = @transform_10, window_bounds = array<i64: 1, 16>}, {pipeline_mode = #tpu.pipeline_mode<synchronous>, transform_indices = @transform_11, window_bounds = array<i64: 1, 16>}, {pipeline_mode = #tpu.pipeline_mode<synchronous>, transform_indices = @transform_12, window_bounds = array<i64: 8, 16>}, {pipeline_mode = #tpu.pipeline_mode<synchronous>, transform_indices = @transform_13, window_bounds = array<i64: 1, 16>}, {pipeline_mode = #tpu.pipeline_mode<synchronous>, transform_indices = @transform_14, window_bounds = array<i64: 1, 16>}, {transform_indices = @transform_15, window_bounds = array<i64: 1, 128, 16>}]} {
    %cst = arith.constant 0.000000e+00 : f32
    %0 = vector.broadcast %cst : f32 to vector<256x128xf32>
    %c0 = arith.constant 0 : index
    %c0_0 = arith.constant 0 : index
    %1 = vector.load %arg18[%c0, %c0_0] : memref<256x128xf32, #tpu.memory_space<vmem>>, vector<256x128xf32>
    tpu.vector_store %arg18[%c0, %c0_0], %0 {strides = array<i32>} : memref<256x128xf32, #tpu.memory_space<vmem>>, vector<256x128xf32>,
    %c0_1 = arith.constant 0 : index
    %c0_2 = arith.constant 0 : index
    %c0_3 = arith.constant 0 : index
    %2 = vector.load %arg2[%c0_1, %c0_2, %c0_3] : memref<1x128x8xbf16, #tpu.memory_space<vmem>>, vector<1x128x8xbf16>
    %3 = vector.shape_cast %2 : vector<1x128x8xbf16> to vector<128x8xbf16>
    %c0_4 = arith.constant 0 : index
    %c0_5 = arith.constant 0 : index
    %4 = vector.load %arg5[%c0_4, %c0_5] : memref<8x128xbf16, #tpu.memory_space<vmem>>, vector<8x128xbf16>
    %cst_6 = arith.constant dense<0.000000e+00> : vector<128x128xf32>
    %5 = tpu.matmul %3, %4, %cst_6 {dimension_numbers = #tpu.dot_dimension_numbers<[1], [0], [0], [1], [0, 0, 1, 1], [], []>} : vector<128x8xbf16>, vector<8x128xbf16>, vector<128x128xf32> -> vector<128x128xf32>
    %c0_7 = arith.constant 0 : index
    %c0_8 = arith.constant 0 : index
    %6 = vector.load %arg6[%c0_7, %c0_8] : memref<1x128xf32, #tpu.memory_space<vmem>>, vector<1x128xf32>
    %7 = vector.broadcast %6 : vector<1x128xf32> to vector<128x128xf32>
    %8 = arith.mulf %5, %7 : vector<128x128xf32>
    %c0_9 = arith.constant 0 : index
    %c0_10 = arith.constant 0 : index
    %9 = vector.load %arg7[%c0_9, %c0_10] : memref<1x128xf32, #tpu.memory_space<vmem>>, vector<1x128xf32>
    %10 = vector.broadcast %9 : vector<1x128xf32> to vector<128x128xf32>
    %11 = arith.addf %8, %10 : vector<128x128xf32>
    %cst_11 = arith.constant 0.000000e+00 : f32
    %12 = vector.broadcast %cst_11 : f32 to vector<128x128xf32>
    %13 = arith.maximumf %11, %12 : vector<128x128xf32>
    %14 = vector.extract_strided_slice %13 {offsets = [0, 0], sizes = [16, 128], strides = [1, 1]} : vector<128x128xf32> to vector<16x128xf32>
    %c32 = arith.constant 32 : index
    %c0_12 = arith.constant 0 : index
    %15 = vector.load %arg18[%c32, %c0_12] : memref<256x128xf32, #tpu.memory_space<vmem>>, vector<16x128xf32>
    tpu.vector_store %arg18[%c32, %c0_12], %14 {strides = array<i32>} : memref<256x128xf32, #tpu.memory_space<vmem>>, vector<16x128xf32>,
    %16 = vector.extract_strided_slice %13 {offsets = [16, 0], sizes = [16, 128], strides = [1, 1]} : vector<128x128xf32> to vector<16x128xf32>
    %c56 = arith.constant 56 : index
    %c0_13 = arith.constant 0 : index
    %17 = vector.load %arg18[%c56, %c0_13] : memref<256x128xf32, #tpu.memory_space<vmem>>, vector<16x128xf32>
    tpu.vector_store %arg18[%c56, %c0_13], %16 {strides = array<i32>} : memref<256x128xf32, #tpu.memory_space<vmem>>, vector<16x128xf32>,
    %18 = vector.extract_strided_slice %13 {offsets = [32, 0], sizes = [16, 128], strides = [1, 1]} : vector<128x128xf32> to vector<16x128xf32>
    %c80 = arith.constant 80 : index
    %c0_14 = arith.constant 0 : index
    %19 = vector.load %arg18[%c80, %c0_14] : memref<256x128xf32, #tpu.memory_space<vmem>>, vector<16x128xf32>
    tpu.vector_store %arg18[%c80, %c0_14], %18 {strides = array<i32>} : memref<256x128xf32, #tpu.memory_space<vmem>>, vector<16x128xf32>,
    %20 = vector.extract_strided_slice %13 {offsets = [48, 0], sizes = [16, 128], strides = [1, 1]} : vector<128x128xf32> to vector<16x128xf32>
    %c104 = arith.constant 104 : index
    %c0_15 = arith.constant 0 : index
    %21 = vector.load %arg18[%c104, %c0_15] : memref<256x128xf32, #tpu.memory_space<vmem>>, vector<16x128xf32>
    tpu.vector_store %arg18[%c104, %c0_15], %20 {strides = array<i32>} : memref<256x128xf32, #tpu.memory_space<vmem>>, vector<16x128xf32>,
    %22 = vector.extract_strided_slice %13 {offsets = [64, 0], sizes = [16, 128], strides = [1, 1]} : vector<128x128xf32> to vector<16x128xf32>
    %c128 = arith.constant 128 : index
    %c0_16 = arith.constant 0 : index
    %23 = vector.load %arg18[%c128, %c0_16] : memref<256x128xf32, #tpu.memory_space<vmem>>, vector<16x128xf32>
    tpu.vector_store %arg18[%c128, %c0_16], %22 {strides = array<i32>} : memref<256x128xf32, #tpu.memory_space<vmem>>, vector<16x128xf32>,
    %24 = vector.extract_strided_slice %13 {offsets = [80, 0], sizes = [16, 128], strides = [1, 1]} : vector<128x128xf32> to vector<16x128xf32>
    %c152 = arith.constant 152 : index
    %c0_17 = arith.constant 0 : index
    %25 = vector.load %arg18[%c152, %c0_17] : memref<256x128xf32, #tpu.memory_space<vmem>>, vector<16x128xf32>
    tpu.vector_store %arg18[%c152, %c0_17], %24 {strides = array<i32>} : memref<256x128xf32, #tpu.memory_space<vmem>>, vector<16x128xf32>,
    %26 = vector.extract_strided_slice %13 {offsets = [96, 0], sizes = [16, 128], strides = [1, 1]} : vector<128x128xf32> to vector<16x128xf32>
    %c176 = arith.constant 176 : index
    %c0_18 = arith.constant 0 : index
    %27 = vector.load %arg18[%c176, %c0_18] : memref<256x128xf32, #tpu.memory_space<vmem>>, vector<16x128xf32>
    tpu.vector_store %arg18[%c176, %c0_18], %26 {strides = array<i32>} : memref<256x128xf32, #tpu.memory_space<vmem>>, vector<16x128xf32>,
    %28 = vector.extract_strided_slice %13 {offsets = [112, 0], sizes = [16, 128], strides = [1, 1]} : vector<128x128xf32> to vector<16x128xf32>
    %c200 = arith.constant 200 : index
    %c0_19 = arith.constant 0 : index
    %29 = vector.load %arg18[%c200, %c0_19] : memref<256x128xf32, #tpu.memory_space<vmem>>, vector<16x128xf32>
    tpu.vector_store %arg18[%c200, %c0_19], %28 {strides = array<i32>} : memref<256x128xf32, #tpu.memory_space<vmem>>, vector<16x128xf32>,
    %c0_20 = arith.constant 0 : index
    %c0_21 = arith.constant 0 : index
    %c0_22 = arith.constant 0 : index
    %30 = vector.load %arg3[%c0_20, %c0_21, %c0_22] : memref<1x16x8xbf16, #tpu.memory_space<vmem>>, vector<1x16x8xbf16>
    %31 = vector.shape_cast %30 : vector<1x16x8xbf16> to vector<16x8xbf16>
    %c0_23 = arith.constant 0 : index
    %c0_24 = arith.constant 0 : index
    %32 = vector.load %arg5[%c0_23, %c0_24] : memref<8x128xbf16, #tpu.memory_space<vmem>>, vector<8x128xbf16>
    %cst_25 = arith.constant dense<0.000000e+00> : vector<16x128xf32>
    %33 = tpu.matmul %31, %32, %cst_25 {dimension_numbers = #tpu.dot_dimension_numbers<[1], [0], [0], [1], [0, 0, 1, 1], [], []>} : vector<16x8xbf16>, vector<8x128xbf16>, vector<16x128xf32> -> vector<16x128xf32>
    %c0_26 = arith.constant 0 : index
    %c0_27 = arith.constant 0 : index
    %34 = vector.load %arg6[%c0_26, %c0_27] : memref<1x128xf32, #tpu.memory_space<vmem>>, vector<1x128xf32>
    %35 = vector.broadcast %34 : vector<1x128xf32> to vector<16x128xf32>
    %36 = arith.mulf %33, %35 : vector<16x128xf32>
    %c0_28 = arith.constant 0 : index
    %c0_29 = arith.constant 0 : index
    %37 = vector.load %arg7[%c0_28, %c0_29] : memref<1x128xf32, #tpu.memory_space<vmem>>, vector<1x128xf32>
    %38 = vector.broadcast %37 : vector<1x128xf32> to vector<16x128xf32>
    %39 = arith.addf %36, %38 : vector<16x128xf32>
    %cst_30 = arith.constant 0.000000e+00 : f32
    %40 = vector.broadcast %cst_30 : f32 to vector<16x128xf32>
    %41 = arith.maximumf %39, %40 : vector<16x128xf32>
    %c0_i32 = arith.constant 0 : i32
    %42 = arith.cmpi sgt, %arg1, %c0_i32 : i32
    %cst_31 = arith.constant 1.000000e+00 : f32
    %cst_32 = arith.constant 0.000000e+00 : f32
    %43 = arith.select %42, %cst_31, %cst_32 : f32
    %44 = vector.broadcast %43 : f32 to vector<16x128xf32>
    %45 = arith.mulf %41, %44 : vector<16x128xf32>
    %c8 = arith.constant 8 : index
    %c0_33 = arith.constant 0 : index
    %46 = vector.load %arg18[%c8, %c0_33] : memref<256x128xf32, #tpu.memory_space<vmem>>, vector<16x128xf32>
    tpu.vector_store %arg18[%c8, %c0_33], %45 {strides = array<i32>} : memref<256x128xf32, #tpu.memory_space<vmem>>, vector<16x128xf32>,
    %c0_34 = arith.constant 0 : index
    %c0_35 = arith.constant 0 : index
    %c0_36 = arith.constant 0 : index
    %47 = vector.load %arg4[%c0_34, %c0_35, %c0_36] : memref<1x16x8xbf16, #tpu.memory_space<vmem>>, vector<1x16x8xbf16>
    %48 = vector.shape_cast %47 : vector<1x16x8xbf16> to vector<16x8xbf16>
    %c0_37 = arith.constant 0 : index
    %c0_38 = arith.constant 0 : index
    %49 = vector.load %arg5[%c0_37, %c0_38] : memref<8x128xbf16, #tpu.memory_space<vmem>>, vector<8x128xbf16>
    %cst_39 = arith.constant dense<0.000000e+00> : vector<16x128xf32>
    %50 = tpu.matmul %48, %49, %cst_39 {dimension_numbers = #tpu.dot_dimension_numbers<[1], [0], [0], [1], [0, 0, 1, 1], [], []>} : vector<16x8xbf16>, vector<8x128xbf16>, vector<16x128xf32> -> vector<16x128xf32>
    %c0_40 = arith.constant 0 : index
    %c0_41 = arith.constant 0 : index
    %51 = vector.load %arg6[%c0_40, %c0_41] : memref<1x128xf32, #tpu.memory_space<vmem>>, vector<1x128xf32>
    %52 = vector.broadcast %51 : vector<1x128xf32> to vector<16x128xf32>
    %53 = arith.mulf %50, %52 : vector<16x128xf32>
    %c0_42 = arith.constant 0 : index
    %c0_43 = arith.constant 0 : index
    %54 = vector.load %arg7[%c0_42, %c0_43] : memref<1x128xf32, #tpu.memory_space<vmem>>, vector<1x128xf32>
    %55 = vector.broadcast %54 : vector<1x128xf32> to vector<16x128xf32>
    %56 = arith.addf %53, %55 : vector<16x128xf32>
    %cst_44 = arith.constant 0.000000e+00 : f32
    %57 = vector.broadcast %cst_44 : f32 to vector<16x128xf32>
    %58 = arith.maximumf %56, %57 : vector<16x128xf32>
    %c1_i32 = arith.constant 1 : i32
    %59 = arith.cmpi slt, %arg1, %c1_i32 : i32
    %cst_45 = arith.constant 1.000000e+00 : f32
    %cst_46 = arith.constant 0.000000e+00 : f32
    %60 = arith.select %59, %cst_45, %cst_46 : f32
    %61 = vector.broadcast %60 : f32 to vector<16x128xf32>
    %62 = arith.mulf %58, %61 : vector<16x128xf32>
    %c224 = arith.constant 224 : index
    %c0_47 = arith.constant 0 : index
    %63 = vector.load %arg18[%c224, %c0_47] : memref<256x128xf32, #tpu.memory_space<vmem>>, vector<16x128xf32>
    tpu.vector_store %arg18[%c224, %c0_47], %62 {strides = array<i32>} : memref<256x128xf32, #tpu.memory_space<vmem>>, vector<16x128xf32>,
    %c7 = arith.constant 7 : index
    %c0_48 = arith.constant 0 : index
    %64 = vector.load %arg18[%c7, %c0_48] : memref<256x128xf32, #tpu.memory_space<vmem>>, vector<192x128xf32>
    %65 = arith.truncf %64 : vector<192x128xf32> to vector<192x128xbf16>
    %c31 = arith.constant 31 : index
    %c0_49 = arith.constant 0 : index
    %66 = vector.load %arg18[%c31, %c0_49] : memref<256x128xf32, #tpu.memory_space<vmem>>, vector<192x128xf32>
    %67 = arith.truncf %66 : vector<192x128xf32> to vector<192x128xbf16>
    %c55 = arith.constant 55 : index
    %c0_50 = arith.constant 0 : index
    %68 = vector.load %arg18[%c55, %c0_50] : memref<256x128xf32, #tpu.memory_space<vmem>>, vector<192x128xf32>
    %69 = arith.truncf %68 : vector<192x128xf32> to vector<192x128xbf16>
    %70 = tpu.concatenate %65, %67, %69 in 1 : vector<192x128xbf16>, vector<192x128xbf16>, vector<192x128xbf16> -> vector<192x384xbf16>
    %c0_51 = arith.constant 0 : index
    %c0_52 = arith.constant 0 : index
    %c0_53 = arith.constant 0 : index
    %71 = vector.load %arg8[%c0_51, %c0_52, %c0_53] : memref<3x384x128xbf16, #tpu.memory_space<vmem>>, vector<1x384x128xbf16>
    %72 = vector.shape_cast %71 : vector<1x384x128xbf16> to vector<384x128xbf16>
    %cst_54 = arith.constant dense<0.000000e+00> : vector<192x128xf32>
    %73 = tpu.matmul %70, %72, %cst_54 {dimension_numbers = #tpu.dot_dimension_numbers<[1], [0], [0], [1], [0, 0, 1, 1], [], []>} : vector<192x384xbf16>, vector<384x128xbf16>, vector<192x128xf32> -> vector<192x128xf32>
    %c8_55 = arith.constant 8 : index
    %c0_56 = arith.constant 0 : index
    %74 = vector.load %arg18[%c8_55, %c0_56] : memref<256x128xf32, #tpu.memory_space<vmem>>, vector<192x128xf32>
    %75 = arith.truncf %74 : vector<192x128xf32> to vector<192x128xbf16>
    %c32_57 = arith.constant 32 : index
    %c0_58 = arith.constant 0 : index
    %76 = vector.load %arg18[%c32_57, %c0_58] : memref<256x128xf32, #tpu.memory_space<vmem>>, vector<192x128xf32>
    %77 = arith.truncf %76 : vector<192x128xf32> to vector<192x128xbf16>
    %c56_59 = arith.constant 56 : index
    %c0_60 = arith.constant 0 : index
    %78 = vector.load %arg18[%c56_59, %c0_60] : memref<256x128xf32, #tpu.memory_space<vmem>>, vector<192x128xf32>
    %79 = arith.truncf %78 : vector<192x128xf32> to vector<192x128xbf16>
    %80 = tpu.concatenate %75, %77, %79 in 1 : vector<192x128xbf16>, vector<192x128xbf16>, vector<192x128xbf16> -> vector<192x384xbf16>
    %c1 = arith.constant 1 : index
    %c0_61 = arith.constant 0 : index
    %c0_62 = arith.constant 0 : index
    %81 = vector.load %arg8[%c1, %c0_61, %c0_62] : memref<3x384x128xbf16, #tpu.memory_space<vmem>>, vector<1x384x128xbf16>
    %82 = vector.shape_cast %81 : vector<1x384x128xbf16> to vector<384x128xbf16>
    %cst_63 = arith.constant dense<0.000000e+00> : vector<192x128xf32>
    %83 = tpu.matmul %80, %82, %cst_63 {dimension_numbers = #tpu.dot_dimension_numbers<[1], [0], [0], [1], [0, 0, 1, 1], [], []>} : vector<192x384xbf16>, vector<384x128xbf16>, vector<192x128xf32> -> vector<192x128xf32>
    %84 = arith.addf %73, %83 : vector<192x128xf32>
    %c9 = arith.constant 9 : index
    %c0_64 = arith.constant 0 : index
    %85 = vector.load %arg18[%c9, %c0_64] : memref<256x128xf32, #tpu.memory_space<vmem>>, vector<192x128xf32>
    %86 = arith.truncf %85 : vector<192x128xf32> to vector<192x128xbf16>
    %c33 = arith.constant 33 : index
    %c0_65 = arith.constant 0 : index
    %87 = vector.load %arg18[%c33, %c0_65] : memref<256x128xf32, #tpu.memory_space<vmem>>, vector<192x128xf32>
    %88 = arith.truncf %87 : vector<192x128xf32> to vector<192x128xbf16>
    %c57 = arith.constant 57 : index
    %c0_66 = arith.constant 0 : index
    %89 = vector.load %arg18[%c57, %c0_66] : memref<256x128xf32, #tpu.memory_space<vmem>>, vector<192x128xf32>
    %90 = arith.truncf %89 : vector<192x128xf32> to vector<192x128xbf16>
    %91 = tpu.concatenate %86, %88, %90 in 1 : vector<192x128xbf16>, vector<192x128xbf16>, vector<192x128xbf16> -> vector<192x384xbf16>
    %c2 = arith.constant 2 : index
    %c0_67 = arith.constant 0 : index
    %c0_68 = arith.constant 0 : index
    %92 = vector.load %arg8[%c2, %c0_67, %c0_68] : memref<3x384x128xbf16, #tpu.memory_space<vmem>>, vector<1x384x128xbf16>
    %93 = vector.shape_cast %92 : vector<1x384x128xbf16> to vector<384x128xbf16>
    %cst_69 = arith.constant dense<0.000000e+00> : vector<192x128xf32>
    %94 = tpu.matmul %91, %93, %cst_69 {dimension_numbers = #tpu.dot_dimension_numbers<[1], [0], [0], [1], [0, 0, 1, 1], [], []>} : vector<192x384xbf16>, vector<384x128xbf16>, vector<192x128xf32> -> vector<192x128xf32>
    %95 = arith.addf %84, %94 : vector<192x128xf32>
    %96 = vector.extract_strided_slice %95 {offsets = [0, 0], sizes = [16, 128], strides = [1, 1]} : vector<192x128xf32> to vector<16x128xf32>
    %97 = vector.extract_strided_slice %95 {offsets = [24, 0], sizes = [16, 128], strides = [1, 1]} : vector<192x128xf32> to vector<16x128xf32>
    %98 = vector.extract_strided_slice %95 {offsets = [48, 0], sizes = [16, 128], strides = [1, 1]} : vector<192x128xf32> to vector<16x128xf32>
    %99 = vector.extract_strided_slice %95 {offsets = [72, 0], sizes = [16, 128], strides = [1, 1]} : vector<192x128xf32> to vector<16x128xf32>
    %100 = vector.extract_strided_slice %95 {offsets = [96, 0], sizes = [16, 128], strides = [1, 1]} : vector<192x128xf32> to vector<16x128xf32>
    %101 = vector.extract_strided_slice %95 {offsets = [120, 0], sizes = [16, 128], strides = [1, 1]} : vector<192x128xf32> to vector<16x128xf32>
    %102 = vector.extract_strided_slice %95 {offsets = [144, 0], sizes = [16, 128], strides = [1, 1]} : vector<192x128xf32> to vector<16x128xf32>
    %103 = vector.extract_strided_slice %95 {offsets = [168, 0], sizes = [16, 128], strides = [1, 1]} : vector<192x128xf32> to vector<16x128xf32>
    %104 = tpu.concatenate %96, %97, %98, %99, %100, %101, %102, %103 in 0 : vector<16x128xf32>, vector<16x128xf32>, vector<16x128xf32>, vector<16x128xf32>, vector<16x128xf32>, vector<16x128xf32>, vector<16x128xf32>, vector<16x128xf32> -> vector<128x128xf32>
    %c0_70 = arith.constant 0 : index
    %c0_71 = arith.constant 0 : index
    %105 = vector.load %arg9[%c0_70, %c0_71] : memref<1x128xf32, #tpu.memory_space<vmem>>, vector<1x128xf32>
    %106 = vector.broadcast %105 : vector<1x128xf32> to vector<128x128xf32>
    %107 = arith.mulf %104, %106 : vector<128x128xf32>
    %c0_72 = arith.constant 0 : index
    %c0_73 = arith.constant 0 : index
    %108 = vector.load %arg10[%c0_72, %c0_73] : memref<1x128xf32, #tpu.memory_space<vmem>>, vector<1x128xf32>
    %109 = vector.broadcast %108 : vector<1x128xf32> to vector<128x128xf32>
    %110 = arith.addf %107, %109 : vector<128x128xf32>
    %cst_74 = arith.constant 0.000000e+00 : f32
    %111 = vector.broadcast %cst_74 : f32 to vector<128x128xf32>
    %112 = arith.maximumf %110, %111 : vector<128x128xf32>
    %113 = arith.truncf %112 : vector<128x128xf32> to vector<128x128xbf16>
    %c0_75 = arith.constant 0 : index
    %c0_76 = arith.constant 0 : index
    %114 = vector.load %arg11[%c0_75, %c0_76] : memref<128x16xbf16, #tpu.memory_space<vmem>>, vector<128x16xbf16>
    %cst_77 = arith.constant dense<0.000000e+00> : vector<128x16xf32>
    %115 = tpu.matmul %113, %114, %cst_77 {dimension_numbers = #tpu.dot_dimension_numbers<[1], [0], [0], [1], [0, 0, 1, 1], [], []>} : vector<128x128xbf16>, vector<128x16xbf16>, vector<128x16xf32> -> vector<128x16xf32>
    %c0_78 = arith.constant 0 : index
    %c0_79 = arith.constant 0 : index
    %116 = vector.load %arg12[%c0_78, %c0_79] : memref<1x16xf32, #tpu.memory_space<vmem>>, vector<1x16xf32>
    %117 = vector.broadcast %116 : vector<1x16xf32> to vector<128x16xf32>
    %118 = arith.mulf %115, %117 : vector<128x16xf32>
    %c0_80 = arith.constant 0 : index
    %c0_81 = arith.constant 0 : index
    %119 = vector.load %arg13[%c0_80, %c0_81] : memref<1x16xf32, #tpu.memory_space<vmem>>, vector<1x16xf32>
    %120 = vector.broadcast %119 : vector<1x16xf32> to vector<128x16xf32>
    %121 = arith.addf %118, %120 : vector<128x16xf32>
    %c0_82 = arith.constant 0 : index
    %c0_83 = arith.constant 0 : index
    %c0_84 = arith.constant 0 : index
    %122 = vector.load %arg2[%c0_82, %c0_83, %c0_84] : memref<1x128x8xbf16, #tpu.memory_space<vmem>>, vector<1x128x8xbf16>
    %123 = vector.shape_cast %122 : vector<1x128x8xbf16> to vector<128x8xbf16>
    %c0_85 = arith.constant 0 : index
    %c0_86 = arith.constant 0 : index
    %124 = vector.load %arg14[%c0_85, %c0_86] : memref<8x16xbf16, #tpu.memory_space<vmem>>, vector<8x16xbf16>
    %cst_87 = arith.constant dense<0.000000e+00> : vector<128x16xf32>
    %125 = tpu.matmul %123, %124, %cst_87 {dimension_numbers = #tpu.dot_dimension_numbers<[1], [0], [0], [1], [0, 0, 1, 1], [], []>} : vector<128x8xbf16>, vector<8x16xbf16>, vector<128x16xf32> -> vector<128x16xf32>
    %c0_88 = arith.constant 0 : index
    %c0_89 = arith.constant 0 : index
    %126 = vector.load %arg15[%c0_88, %c0_89] : memref<1x16xf32, #tpu.memory_space<vmem>>, vector<1x16xf32>
    %127 = vector.broadcast %126 : vector<1x16xf32> to vector<128x16xf32>
    %128 = arith.mulf %125, %127 : vector<128x16xf32>
    %c0_90 = arith.constant 0 : index
    %c0_91 = arith.constant 0 : index
    %129 = vector.load %arg16[%c0_90, %c0_91] : memref<1x16xf32, #tpu.memory_space<vmem>>, vector<1x16xf32>
    %130 = vector.broadcast %129 : vector<1x16xf32> to vector<128x16xf32>
    %131 = arith.addf %128, %130 : vector<128x16xf32>
    %132 = arith.addf %121, %131 : vector<128x16xf32>
    %cst_92 = arith.constant 0.000000e+00 : f32
    %133 = vector.broadcast %cst_92 : f32 to vector<128x16xf32>
    %134 = arith.maximumf %132, %133 : vector<128x16xf32>
    %135 = arith.truncf %134 : vector<128x16xf32> to vector<128x16xbf16>
    %c0_93 = arith.constant 0 : index
    %c0_94 = arith.constant 0 : index
    %c0_95 = arith.constant 0 : index
    %136 = vector.load %arg17[%c0_93, %c0_94, %c0_95] : memref<1x128x16xbf16, #tpu.memory_space<vmem>>, vector<1x128x16xbf16>
    %137 = vector.shape_cast %136 : vector<1x128x16xbf16> to vector<128x16xbf16>
    %138 = vector.shape_cast %135 : vector<128x16xbf16> to vector<1x128x16xbf16>
    tpu.vector_store %arg17[%c0_93, %c0_94, %c0_95], %138 {strides = array<i32>} : memref<1x128x16xbf16, #tpu.memory_space<vmem>>, vector<1x128x16xbf16>,
    return
  }
  func.func @transform_0(%arg0: i32, %arg1: i32) -> (i32, i32, i32) {
    %c0_i32 = arith.constant 0 : i32
    %c0_i32_0 = arith.constant 0 : i32
    return %arg0, %arg1, %c0_i32 : i32, i32, i32
  }
  func.func @transform_1(%arg0: i32, %arg1: i32) -> (i32, i32, i32) {
    %c8_i32 = arith.constant 8 : i32
    %0 = arith.muli %arg1, %c8_i32 : i32
    %c1_i32 = arith.constant 1 : i32
    %1 = arith.subi %0, %c1_i32 : i32
    %c0_i32 = arith.constant 0 : i32
    %2 = arith.maxsi %1, %c0_i32 : i32
    %c0_i32_0 = arith.constant 0 : i32
    %c0_i32_1 = arith.constant 0 : i32
    return %arg0, %2, %c0_i32_0 : i32, i32, i32
  }
  func.func @transform_2(%arg0: i32, %arg1: i32) -> (i32, i32, i32) {
    %c8_i32 = arith.constant 8 : i32
    %0 = arith.muli %arg1, %c8_i32 : i32
    %c8_i32_0 = arith.constant 8 : i32
    %1 = arith.addi %0, %c8_i32_0 : i32
    %c15_i32 = arith.constant 15 : i32
    %2 = arith.minsi %1, %c15_i32 : i32
    %c0_i32 = arith.constant 0 : i32
    %c0_i32_1 = arith.constant 0 : i32
    return %arg0, %2, %c0_i32 : i32, i32, i32
  }
  func.func @transform_3(%arg0: i32, %arg1: i32) -> (i32, i32) {
    %c0_i32 = arith.constant 0 : i32
    %c0_i32_0 = arith.constant 0 : i32
    %c0_i32_1 = arith.constant 0 : i32
    return %c0_i32, %c0_i32_0 : i32, i32
  }
  func.func @transform_4(%arg0: i32, %arg1: i32) -> (i32, i32) {
    %c0_i32 = arith.constant 0 : i32
    %c0_i32_0 = arith.constant 0 : i32
    %c0_i32_1 = arith.constant 0 : i32
    return %c0_i32, %c0_i32_0 : i32, i32
  }
  func.func @transform_5(%arg0: i32, %arg1: i32) -> (i32, i32) {
    %c0_i32 = arith.constant 0 : i32
    %c0_i32_0 = arith.constant 0 : i32
    %c0_i32_1 = arith.constant 0 : i32
    return %c0_i32, %c0_i32_0 : i32, i32
  }
  func.func @transform_6(%arg0: i32, %arg1: i32) -> (i32, i32, i32) {
    %c0_i32 = arith.constant 0 : i32
    %c0_i32_0 = arith.constant 0 : i32
    %c0_i32_1 = arith.constant 0 : i32
    %c0_i32_2 = arith.constant 0 : i32
    return %c0_i32, %c0_i32_0, %c0_i32_1 : i32, i32, i32
  }
  func.func @transform_7(%arg0: i32, %arg1: i32) -> (i32, i32) {
    %c0_i32 = arith.constant 0 : i32
    %c0_i32_0 = arith.constant 0 : i32
    %c0_i32_1 = arith.constant 0 : i32
    return %c0_i32, %c0_i32_0 : i32, i32
  }
  func.func @transform_8(%arg0: i32, %arg1: i32) -> (i32, i32) {
    %c0_i32 = arith.constant 0 : i32
    %c0_i32_0 = arith.constant 0 : i32
    %c0_i32_1 = arith.constant 0 : i32
    return %c0_i32, %c0_i32_0 : i32, i32
  }
  func.func @transform_9(%arg0: i32, %arg1: i32) -> (i32, i32) {
    %c0_i32 = arith.constant 0 : i32
    %c0_i32_0 = arith.constant 0 : i32
    %c0_i32_1 = arith.constant 0 : i32
    return %c0_i32, %c0_i32_0 : i32, i32
  }
  func.func @transform_10(%arg0: i32, %arg1: i32) -> (i32, i32) {
    %c0_i32 = arith.constant 0 : i32
    %c0_i32_0 = arith.constant 0 : i32
    %c0_i32_1 = arith.constant 0 : i32
    return %c0_i32, %c0_i32_0 : i32, i32
  }
  func.func @transform_11(%arg0: i32, %arg1: i32) -> (i32, i32) {
    %c0_i32 = arith.constant 0 : i32
    %c0_i32_0 = arith.constant 0 : i32
    %c0_i32_1 = arith.constant 0 : i32
    return %c0_i32, %c0_i32_0 : i32, i32
  }
  func.func @transform_12(%arg0: i32, %arg1: i32) -> (i32, i32) {
    %c0_i32 = arith.constant 0 : i32
    %c0_i32_0 = arith.constant 0 : i32
    %c0_i32_1 = arith.constant 0 : i32
    return %c0_i32, %c0_i32_0 : i32, i32
  }
  func.func @transform_13(%arg0: i32, %arg1: i32) -> (i32, i32) {
    %c0_i32 = arith.constant 0 : i32
    %c0_i32_0 = arith.constant 0 : i32
    %c0_i32_1 = arith.constant 0 : i32
    return %c0_i32, %c0_i32_0 : i32, i32
  }
  func.func @transform_14(%arg0: i32, %arg1: i32) -> (i32, i32) {
    %c0_i32 = arith.constant 0 : i32
    %c0_i32_0 = arith.constant 0 : i32
    %c0_i32_1 = arith.constant 0 : i32
    return %c0_i32, %c0_i32_0 : i32, i32
  }
  func.func @transform_15(%arg0: i32, %arg1: i32) -> (i32, i32, i32) {
    %c0_i32 = arith.constant 0 : i32
    %c0_i32_0 = arith.constant 0 : i32
    return %arg0, %arg1, %c0_i32 : i32, i32, i32
  }
}

</mosaic_0001>

<bundles_post_ra>
// kernel: tpu_custom_call.1
= control target key start
LH: loop header
LB: loop body
LE: loop exit
PB: predicated region body
PF: predicated region fallthrough
CT: control target
= control target key end

     0   :  { %s4930_s0 = inlined_call_operand.vmem [shape: bf16[2,256,8], index: 0, kind: input, shape index: {}]   ;;  %s4931_s1 = inlined_call_operand.vmem [shape: bf16[2,256,8], index: 1, kind: input, shape index: {}]   ;;  %s4932_s2 = inlined_call_operand.vmem [shape: bf16[2,256,8], index: 2, kind: input, shape index: {}]   ;;  %s4933_s3 = inlined_call_operand.vmem [shape: bf16[8,128], index: 3, kind: input, shape index: {}]   ;;  %s4934_s4 = inlined_call_operand.vmem [shape: f32[1,128], index: 4, kind: input, shape index: {}]   ;;  %s4935_s5 = inlined_call_operand.vmem [shape: f32[1,128], index: 5, kind: input, shape index: {}]   ;;  %s4936_s6 = inlined_call_operand.hbm [shape: bf16[3,384,128], index: 6, kind: input, shape index: {}]   ;;  %s4937_s7 = inlined_call_operand.vmem [shape: f32[1,128], index: 7, kind: input, shape index: {}]   ;;  %s4938_s8 = inlined_call_operand.vmem [shape: f32[1,128], index: 8, kind: input, shape index: {}]   ;;  %s4939_s9 = inlined_call_operand.vmem [shape: bf16[128,16], index: 9, kind: input, shape index: {}]   ;;  %s4940_s10 = inlined_call_operand.vmem [shape: f32[1,16], index: 10, kind: input, shape index: {}]   ;;  %s4941_s11 = inlined_call_operand.vmem [shape: f32[1,16], index: 11, kind: input, shape index: {}]   ;;  %s4942_s12 = inlined_call_operand.vmem [shape: bf16[8,16], index: 12, kind: input, shape index: {}]   ;;  %s4943_s13 = inlined_call_operand.vmem [shape: f32[1,16], index: 13, kind: input, shape index: {}]   ;;  %s4944_s14 = inlined_call_operand.vmem [shape: f32[1,16], index: 14, kind: input, shape index: {}]   ;;  %s4945_s15 = inlined_call_operand.vmem [shape: bf16[2,256,16], index: 15, kind: output, shape index: {}]  }
   0x1   :  { %4947 = sst [smem:[#allocation9_spill]] %s4936_s6 }
   0x2   :  { %20 = vsyncpa [#allocation4], 0  ;;  %s4046_s18 = smov 0   ;;  %s4048_s19 = smov 0  }
   0x3   :  { %s4050_s20 = smov 0   ;;  %s4052_s21 = smov 0  }
   0x4   :  { %s4054_s22 = smov 0  }
   0x5 LB: > { %4948 = sst [smem:[#allocation6_spill]] %s3955_s21  ;;  %s3275_s23 = sadd.s32 4294967295, %s3959_s22   ;;  %s3959_s22 = sphi %s4054_s22, %s26_s22   ;;  %s3955_s21 = sphi %s4052_s21, %s4956_s21   ;;  %s3951_s20 = sphi %s4050_s20, %s4958_s20   ;;  %s3947_s19 = sphi %s4048_s19, %s4954_s19   ;;  %s3943_s18 = sphi %s4046_s18, %s4957_s18  }
   0x6   : > { %s35_s24 = sadd.s32 1, %s3951_s20  ;;  %s38_s25 = sadd.s32 1, %s3955_s21 }
   0x7   : > { %p36_p0 = scmp.ge.s32.totalorder %s35_s24, 2  ;;  %p3283_p1 = scmp.ge.s32.totalorder %s3959_s22, 1 }
   0x8   : > { %p423_p2 = scmp.lt.s32.totalorder %s3959_s22, 5  ;;  %p4083_p5 = scmp.eq.s32.totalorder %s3275_s23, 0 }
   0x9   : > { %s4960_s24 = smov (%p36_p0, %s35_s24), 0  ;;  %s4962_s25 = smov (!%p36_p0, %s38_s25), %s3955_s21 }
   0xa   : > { %4949 = sst [smem:[#allocation7_spill]] %s4960_s24  ;;  %p4079_p3 = pnand %p3283_p1, %p423_p2 }
   0xb   : > { %p40_p4 = scmp.ge.s32.totalorder %s4962_s25, 2  ;;  %s4952_s6 = sld [smem:[#allocation9_spill]] }
   0xc   : > { %p3825_p6 = pneg %p4079_p3  ;;  %s3961_s16 = smov [#allocation3]  }
   0xd   : > { %s4964_s25 = smov (%p40_p4, %s4962_s25), 0  ;;  %s445_s17 = sshll.u32 %s3961_s16, 4  ;;  %s446_s17 = int_to_ptr.vmem [resolvable:$true] %s445_s17 }
   0xe   : > { %4953 = sst [smem:[#allocation8_spill]] %s4964_s25  ;;  %p3826_p7 = pnand %p4083_p5, %p3825_p6 }
   0xf   : > { %s3962_s24 = smov 64   ;;  %s3963_s23 = smov 4  }
  0x10   : > { %540 = sbr.rel (%p4079_p3) target bundleno = 993 (0x3e1), region = 80 }
  0x11   : > { %s443_s30 = sshll.u32 %s4952_s6, 4  ;;  %s444_s30 = int_to_ptr.hbm [resolvable:$true] %s443_s30 }
  0x12   : > { %3828 = dma.hbm_to_vmem [thread:$0]  (!%p3826_p7), %s444_s30, 9216, %s446_s17, [#allocation4], %s3962_s24, %s3962_s24, %s3963_s23  }
  0x15   : > { %3938 = dma.done.wait (%p4083_p5), [#allocation4], 9216  }
  0x16   : > { %3940 = vsyncadd (%p4083_p5), [#allocation4], 4294958080  ;;  %s3288_s28 = sshll.u32 %s3943_s18, 4  ;;  %p624_p8 = scmp.lt.s32.totalorder %s3947_s19, 1  ;;  %vm794_vm0 = vcmask 1043456   ;;  %vm769_vm1 = vcmask 64512  }
  0x17   : > { %p626_p9 = scmp.lt.s32.totalorder %s3288_s28, 31  ;;  %s3291_s29 = sshll.u32 %s3943_s18, 3  ;;  %v728_v0 = vld [vmem:[%s4933_s3] sm:$0xf]  ;;  %v3764_v10 = vld [vmem:[#allocation3 + $0x138] sm:$0xff]  ;;  %v3964_v11 = vmov 0.0  }
  0x18   : > { %s4966_s19 = smov (!%p624_p8, %s3947_s19), 1  ;;  %s3292_s26 = sadd.s32 4294967295, %s3291_s29  ;;  %v921_v1 = vld [vmem:[%s4933_s3] sm:$0xf]  ;;  %v796_v2 = vsel %vm794_vm0, %v728_v0, 0  ;;  %680 = vst [vmem:[#allocation2] sm:$0xff] %v3964_v11 }
  0x19   : > { %s4968_s28 = smov (!%p626_p9, %s3288_s28), 31  ;;  %s4106_s24 = sshll.u32 %s4966_s19, 5  ;;  %v931_v4 = vsel %vm794_vm0, %v921_v1, 0  ;;  %805 = vmatpush.bf16.msra.mxu0 %v796_v2  ;;  %683 = vst [vmem:[#allocation2 + $0x18] sm:$0xff] %v3964_v11  ;;  %v3763_v13 = vld [vmem:[#allocation3 + $0x130] sm:$0xff]  ;;  %v3756_v14 = vld [vmem:[#allocation3 + $0xf8] sm:$0xff] }
  0x1a   : > { %s629_s30 = sadd.s32 %s4106_s24, %s4968_s28  ;;  %p635_p10 = scmp.gt.s32.totalorder %s3292_s26, 0  ;;  %940 = vmatpush.bf16.msra.mxu1 %v931_v4  ;;  %686 = vst [vmem:[#allocation2 + $0x30] sm:$0xff] %v3964_v11  ;;  %v3762_v16 = vld [vmem:[#allocation3 + $0x128] sm:$0xff]  ;;  %3813 = vmatpush.bf16.msra.mxu3 %v3756_v14  ;;  %v3755_v17 = vld [vmem:[#allocation3 + $0xf0] sm:$0xff]  ;;  %v3761_v18 = vld [vmem:[#allocation3 + $0x120] sm:$0xff]  ;;  %vm3120_vm2 = vcmask 125952  }
  0x1b   : > { %s4109_s27 = sshll.u32 %s629_s30, 2  ;;  %s652_s23 = sadd.s32 8, %s3291_s29  ;;  %689 = vst [vmem:[#allocation2 + $0x48] sm:$0xff] %v3964_v11  ;;  %v3754_v19 = vld [vmem:[#allocation3 + $0xe8] sm:$0xff]  ;;  %v970_v20 = vld [vmem:[%s4933_s3] sm:$0xf] }
  0x1c   : > { %s4118_s25 = scalar_lea.vmem %s4930_s0, %s4109_s27  ;;  %s4970_s26 = smov (!%p635_p10, %s3292_s26), 0  ;;  %692 = vst [vmem:[#allocation2 + $0x60] sm:$0xff] %v3964_v11  ;;  %v980_v21 = vsel %vm794_vm0, %v970_v20, 0  ;;  %v3760_v22 = vld [vmem:[#allocation3 + $0x118] sm:$0xff]  ;;  %v3753_v24 = vld [vmem:[#allocation3 + $0xe0] sm:$0xff]  ;;  %v3759_v25 = vld [vmem:[#allocation3 + $0x110] sm:$0xff] }
  0x1d   : > { %v3715_v3 = vld [vmem:[%s4118_s25] sm:$0xff]  ;;  %s3293_s28 = sshll.u32 %s4970_s26, 1  ;;  %p653_p12 = scmp.lt.s32.totalorder %s652_s23, 15  ;;  %v3716_v6 = vld [vmem:[%s4118_s25 + $0x8] sm:$0xff]  ;;  %v3717_v7 = vld [vmem:[%s4118_s25 + $0x10] sm:$0xff]  ;;  %695 = vst [vmem:[#allocation2 + $0x78] sm:$0xff] %v3964_v11  ;;  %1606 = vmatpush.bf16.msrb.mxu0 %v3756_v14  ;;  %989 = vmatpush.bf16.msra.mxu2 %v980_v21 }
  0x1e   : > { %p640_p11 = scmp.lt.s32.totalorder %s3293_s28, 31  ;;  %3335 = vmatmul.msk.bf16.vlgmr.msra.gmra.mxu0 %vm769_vm1, %v3715_v3  ;;  %v3718_v8 = vld [vmem:[%s4118_s25 + $0x18] sm:$0xff]  ;;  %v3719_v9 = vld [vmem:[%s4118_s25 + $0x20] sm:$0xff]  ;;  %1667 = vmatpush.bf16.msrb.mxu1 %v3764_v10  ;;  %698 = vst [vmem:[#allocation2 + $0x90] sm:$0xff] %v3964_v11  ;;  %v3720_v12 = vld [vmem:[%s4118_s25 + $0x28] sm:$0xff]  ;;  %p961_p0 = scmp.gt.s32.totalorder %s3943_s18, 0 }
  0x1f   : > { %s4974_s23 = smov (!%p653_p12, %s652_s23), 15  ;;  %701 = vst [vmem:[#allocation2 + $0xa8] sm:$0xff] %v3964_v11  ;;  %v3721_v15 = vld [vmem:[%s4118_s25 + $0x30] sm:$0xff]  ;;  %3814 = vmatpush.bf16.msra.mxu3 %v3755_v17  ;;  %v3772_v23 = vld [vmem:[#allocation3 + $0x178] sm:$0xff]  ;;  %v3758_v29 = vld [vmem:[#allocation3 + $0x108] sm:$0xff]  ;;  %p1010_p1 = scmp.lt.s32.totalorder %s3943_s18, 1 }
  0x20   : > { %s4972_s28 = smov (!%p640_p11, %s3293_s28), 31  ;;  %s3297_s26 = sshll.u32 %s4974_s23, 1  ;;  %704 = vst [vmem:[#allocation2 + $0xc0] sm:$0xff] %v3964_v11  ;;  %v3771_v26 = vld [vmem:[#allocation3 + $0x170] sm:$0xff]  ;;  %v3752_v27 = vld [vmem:[#allocation3 + $0xd8] sm:$0xff]  ;;  %v3770_v30 = vld [vmem:[#allocation3 + $0x168] sm:$0xff] }
  0x21   : > { %s643_s6 = sadd.s32 %s4106_s24, %s4972_s28  ;;  %p658_p13 = scmp.lt.s32.totalorder %s3297_s26, 31  ;;  %707 = vst [vmem:[#allocation2 + $0xd8] sm:$0xff] %v3964_v11  ;;  %1607 = vmatpush.bf16.msrb.mxu0 %v3755_v17  ;;  %1728 = vmatpush.bf16.msrb.mxu2 %v3772_v23  ;;  %v3722_v28 = vld [vmem:[%s4118_s25 + $0x38] sm:$0xff]  ;;  %v3751_v31 = vld [vmem:[#allocation3 + $0xd0] sm:$0xff]  ;;  %v3757_v32 = vld [vmem:[#allocation3 + $0x100] sm:$0xff] }
  0x22   : > { %s3295_s21 = sshll.u32 %s643_s6, 2  ;;  %710 = vst [vmem:[#allocation2 + $0xf0] sm:$0xff] %v3964_v11  ;;  %1668 = vmatpush.bf16.msrb.mxu1 %v3763_v13  ;;  %v3769_v33 = vld [vmem:[#allocation3 + $0x160] sm:$0xff]  ;;  %v3750_v34 = vld [vmem:[#allocation3 + $0xc8] sm:$0xff]  ;;  %v3768_v36 = vld [vmem:[#allocation3 + $0x158] sm:$0xff]  ;;  %s4810_s30 = scalar_lea.vmem %s4945_s15, %s4109_s27 }
  0x23   : > { %s645_s17 = scalar_lea.vmem %s4931_s1, %s3295_s21  ;;  %s4976_s26 = smov (!%p658_p13, %s3297_s26), 31  ;;  %711 = vst [vmem:[#allocation2 + $0xf8] sm:$0xff] %v3964_v11  ;;  %3815 = vmatpush.bf16.msra.mxu3 %v3754_v19  ;;  %v3749_v37 = vld [vmem:[#allocation3 + $0xc0] sm:$0xff]  ;;  %v3767_v38 = vld [vmem:[#allocation3 + $0x150] sm:$0xff]  ;;  %v3766_v42 = vld [vmem:[#allocation3 + $0x148] sm:$0xff] }
  0x24   : > { %v3723_v5 = vld [vmem:[%s645_s17] sm:$0xff]  ;;  %s661_s19 = sadd.s32 %s4106_s24, %s4976_s26  ;;  %v3732_v59 = vld [vmem:[#allocation3 + $0x38] sm:$0xff]  ;;  %v3730_v14 = vld [vmem:[#allocation3 + $0x28] sm:$0xff] }
  0x25   : > { %3347 = vmatmul.msk.bf16.vlgmr.msra.gmra.mxu1 %vm769_vm1, %v3723_v5  ;;  %1608 = vmatpush.bf16.msrb.mxu0 %v3754_v19  ;;  %s3299_s6 = sshll.u32 %s661_s19, 2  ;;  %v4164_v39 = vld [vmem:[%s4934_s4] ss:$0 sm:$0xff]  ;;  %v3740_v62 = vld [vmem:[#allocation3 + $0x78] sm:$0xff] }
  0x26   : > { %1669 = vmatpush.bf16.msrb.mxu1 %v3762_v16  ;;  %1729 = vmatpush.bf16.msrb.mxu2 %v3771_v26  ;;  %s663_s16 = scalar_lea.vmem %s4932_s2, %s3299_s6  ;;  %v4169_v40 = vld [vmem:[%s4935_s5] ss:$0 sm:$0xff] }
  0x27   : > { %3816 = vmatpush.bf16.msra.mxu3 %v3753_v24  ;;  %v3724_v35 = vld [vmem:[%s663_s16] sm:$0xff]  ;;  %s4180_s21 = scalar_select %p961_p0, 1.0, 0.0 }
  0x28   : > { %3352 = vmatmul.msk.bf16.vlgmr.msra.gmra.mxu2 %vm769_vm1, %v3724_v35  ;;  %v3765_v45 = vld [vmem:[#allocation3 + $0x140] sm:$0xff]  ;;  %s1011_s18 = scalar_select %p1010_p1, 1.0, 0.0 }
  0x29   : > { %1609 = vmatpush.bf16.msrb.mxu0 %v3753_v24  ;;  %v3877_v47 = vld [vmem:[%s4934_s4] ss:$0 sm:$0xff]  ;;  %v963_v55 = vstv %s4180_s21 }
  0x2a   : > { %1670 = vmatpush.bf16.msrb.mxu1 %v3761_v18  ;;  %1730 = vmatpush.bf16.msrb.mxu2 %v3770_v30  ;;  %v3878_v48 = vld [vmem:[%s4935_s5] ss:$0 sm:$0xff] }
  0x2b   : > { %3817 = vmatpush.bf16.msra.mxu3 %v3752_v27  ;;  %v3729_v24 = vld [vmem:[#allocation3 + $0x20] sm:$0xff] }
  0x2d   : > { %1610 = vmatpush.bf16.msrb.mxu0 %v3752_v27 }
  0x2e   : > { %3336 = vmatmul.msk.bf16.gmra.mxu0 %vm769_vm1, %v3716_v6  ;;  %1671 = vmatpush.bf16.msrb.mxu1 %v3760_v22  ;;  %v3731_v6 = vld [vmem:[#allocation3 + $0x30] sm:$0xff] }
  0x2f   : > { %3818 = vmatpush.bf16.msra.mxu3 %v3751_v31  ;;  %1731 = vmatpush.bf16.msrb.mxu2 %v3769_v33 }
  0x31   : > { %1611 = vmatpush.bf16.msrb.mxu0 %v3751_v31 }
  0x32   : > { %1672 = vmatpush.bf16.msrb.mxu1 %v3759_v25 }
  0x33   : > { %3819 = vmatpush.bf16.msra.mxu3 %v3750_v34  ;;  %1732 = vmatpush.bf16.msrb.mxu2 %v3768_v36 }
  0x35   : > { %1612 = vmatpush.bf16.msrb.mxu0 %v3750_v34 }
  0x36   : > { %1673 = vmatpush.bf16.msrb.mxu1 %v3758_v29 }
  0x37   : > { %3820 = vmatpush.bf16.msra.mxu3 %v3749_v37  ;;  %1733 = vmatpush.bf16.msrb.mxu2 %v3767_v38 }
  0x39   : > { %1613 = vmatpush.bf16.msrb.mxu0 %v3749_v37  ;;  %v3739_v37 = vld [vmem:[#allocation3 + $0x70] sm:$0xff] }
  0x3a   : > { %1674 = vmatpush.bf16.msrb.mxu1 %v3757_v32  ;;  %v3728_v32 = vld [vmem:[#allocation3 + $0x18] sm:$0xff] }
  0x3b   : > { %1734 = vmatpush.bf16.msrb.mxu2 %v3766_v42  ;;  %1994 = vmatpush.bf16.msrb.mxu3 %v3740_v62  ;;  %v3725_v62 = vld [vmem:[#allocation3] sm:$0xff] }
  0x3d   : > { %1933 = vmatpush.bf16.msra.mxu0 %v3732_v59 }
  0x3e   : > { %3337 = vmatmul.msk.bf16.gmra.mxu0 %vm769_vm1, %v3717_v7 }
  0x3f   : > { %1735 = vmatpush.bf16.msrb.mxu2 %v3765_v45  ;;  %1995 = vmatpush.bf16.msrb.mxu3 %v3739_v37 }
  0x41   : > { %1934 = vmatpush.bf16.msra.mxu0 %v3731_v6 }
  0x45   : > { %1935 = vmatpush.bf16.msra.mxu0 %v3730_v14 }
  0x49   : > { %1936 = vmatpush.bf16.msra.mxu0 %v3729_v24 }
  0x4d   : > { %1937 = vmatpush.bf16.msra.mxu0 %v3728_v32 }
  0x4e   : > { %3338 = vmatmul.msk.bf16.gmra.mxu0 %vm769_vm1, %v3718_v8 }
  0x5e   : > { %3339 = vmatmul.msk.bf16.gmra.mxu0 %vm769_vm1, %v3719_v9 }
  0x6e   : > { %3340 = vmatmul.msk.bf16.gmra.mxu0 %vm769_vm1, %v3720_v12 }
  0x7e   : > { %3341 = vmatmul.msk.bf16.gmra.mxu0 %vm769_vm1, %v3721_v15 }
  0x8e   : > { %3342 = vmatmul.msk.bf16.gmra.mxu0 %vm769_vm1, %v3722_v28 }
  0x9b   : > { %v807_v41 = vpop.f32.mrf.mxu0 }
  0x9c   : > { %v851_v43 = vmul.f32 %v4164_v39, %v807_v41 }
  0x9e   : > { %v871_v44 = vadd.f32 %v4169_v40, %v851_v43 }
  0xa0   : > { %v887_v46 = vmax.f32 %v871_v44, 0.0  ;;  %v3965_v44 = vmov 0.0|0.0  }
  0xa1   : > { %v4202_v45 = vunpack.c.l.b16 %v3965_v44 }
  0xa2   : > { %903 = vst [vmem:[#allocation2 + $0x20] sm:$0xff] %v887_v46  ;;  %v942_v49 = vpop.f32.mrf.mxu1  ;;  %v1266_v58 = vpack.c.bf16 %v887_v46, %v887_v46 }
  0xa3   : > { %v809_v50 = vpop.f32.mrf.mxu0  ;;  %v951_v51 = vmul.f32 %v3877_v47, %v942_v49 }
  0xa4   : > { %v852_v52 = vmul.f32 %v4164_v39, %v809_v50  ;;  %v4186_v3 = vunpack.c.l.b16 %v1266_v58 }
  0xa5   : > { %v957_v53 = vadd.f32 %v3878_v48, %v951_v51 }
  0xa6   : > { %v872_v54 = vadd.f32 %v4169_v40, %v852_v52  ;;  %v1348_v6 = vpack.c.b16 %v4186_v3, %v4202_v45 }
  0xa7   : > { %v959_v56 = vmax.f32 %v957_v53, 0.0 }
  0xa8   : > { %v888_v57 = vmax.f32 %v872_v54, 0.0  ;;  %v3726_v54 = vld [vmem:[#allocation3 + $0x8] sm:$0xff] }
  0xa9   : > { %v964_v60 = vmul.f32 %v963_v55, %v959_v56  ;;  %v1020_v5 = vld [vmem:[#allocation2 + $0x1f] sm:$0xff] }
  0xaa   : > { %904 = vst [vmem:[#allocation2 + $0x28] sm:$0xff] %v888_v57  ;;  %v1267_v61 = vpack.c.bf16 %v888_v57, %v888_v57  ;;  %v944_v63 = vpop.f32.mrf.mxu1  ;;  %v1044_v10 = vpack.c.bf16 %v1020_v5, %v1020_v5 }
  0xab   : > { %v812_v0 = vpop.f32.mrf.mxu0  ;;  %966 = vst [vmem:[#allocation2 + $0x8] sm:$0xff] %v964_v60  ;;  %v952_v1 = vmul.f32 %v3877_v47, %v944_v63  ;;  %v1263_v13 = vpack.c.bf16 %v964_v60, %v964_v60  ;;  %v3727_v47 = vld [vmem:[#allocation3 + $0x10] sm:$0xff] }
  0xac   : > { %v853_v2 = vmul.f32 %v4164_v39, %v812_v0  ;;  %v4188_v4 = vunpack.c.l.b16 %v1267_v61  ;;  %v4193_v19 = vunpack.c.l.b16 %v1044_v10  ;;  %1938 = vmatpush.bf16.msra.mxu0 %v3727_v47 }
  0xad   : > { %v958_v7 = vadd.f32 %v3878_v48, %v952_v1  ;;  %v1323_v22 = vunpack.c.l.b16 %v1263_v13 }
  0xae   : > { %v873_v8 = vadd.f32 %v4169_v40, %v853_v2  ;;  %v1377_v9 = vpack.c.b16 %v4188_v4, %v4186_v3 }
  0xaf   : > { %v960_v11 = vmax.f32 %v958_v7, 0.0 }
  0xb0   : > { %v889_v12 = vmax.f32 %v873_v8, 0.0  ;;  %1675 = vmatmul.bf16.vlgmr.msrb.gmra.mxu1 %v1377_v9  ;;  %1939 = vmatpush.bf16.msra.mxu0 %v3726_v54  ;;  %v3738_v8 = vld [vmem:[#allocation3 + $0x68] sm:$0xff] }
  0xb1   : > { %v1021_v15 = vld [vmem:[#allocation2 + $0x27] sm:$0xff]  ;;  %v965_v16 = vmul.f32 %v963_v55, %v960_v11  ;;  %v1022_v28 = vld [vmem:[#allocation2 + $0x2f] sm:$0xff]  ;;  %1996 = vmatpush.bf16.msrb.mxu3 %v3738_v8 }
  0xb2   : > { %905 = vst [vmem:[#allocation2 + $0x38] sm:$0xff] %v889_v12  ;;  %v1045_v17 = vpack.c.bf16 %v1021_v15, %v1021_v15  ;;  %v1269_v27 = vpack.c.bf16 %v889_v12, %v889_v12  ;;  %v1046_v33 = vpack.c.bf16 %v1022_v28, %v1022_v28 }
  0xb3   : > { %v814_v18 = vpop.f32.mrf.mxu0  ;;  %967 = vst [vmem:[#allocation2 + $0x10] sm:$0xff] %v965_v16  ;;  %v1264_v21 = vpack.c.bf16 %v965_v16, %v965_v16 }
  0xb4   : > { %v854_v20 = vmul.f32 %v4164_v39, %v814_v18  ;;  %v4196_v23 = vunpack.c.l.b16 %v1045_v17  ;;  %v1329_v36 = vunpack.c.l.b16 %v1269_v27  ;;  %v4206_v48 = vunpack.c.l.b16 %v1046_v33  ;;  %1940 = vmatpush.bf16.msra.mxu0 %v3725_v62  ;;  %v3737_v17 = vld [vmem:[#allocation3 + $0x60] sm:$0xff] }
  0xb5   : > { %v1324_v26 = vunpack.c.l.b16 %v1264_v21  ;;  %1997 = vmatpush.bf16.msrb.mxu3 %v3737_v17 }
  0xb6   : > { %v874_v25 = vadd.f32 %v4169_v40, %v854_v20  ;;  %v1155_v29 = vpack.c.b16 %v4196_v23, %v4193_v19  ;;  %v1378_v51 = vpack.c.b16 %v1329_v36, %v4202_v45 }
  0xb7   : > { %v1347_v31 = vpack.c.b16 %v1324_v26, %v1323_v22 }
  0xb8   : > { %v890_v30 = vmax.f32 %v874_v25, 0.0 }
  0xb9   : > { %v1023_v34 = vld [vmem:[#allocation2 + $0x37] sm:$0xff]  ;;  %1614 = vmatmul.bf16.vlgmr.msrb.gmra.mxu0 %v1347_v31  ;;  %v1349_v31 = vpack.c.b16 %v4202_v45, %v4188_v4 }
  0xba   : > { %906 = vst [vmem:[#allocation2 + $0x40] sm:$0xff] %v890_v30  ;;  %v1270_v35 = vpack.c.bf16 %v890_v30, %v890_v30  ;;  %v1047_v38 = vpack.c.bf16 %v1023_v34, %v1023_v34 }
  0xbb   : > { %v817_v41 = vpop.f32.mrf.mxu0 }
  0xbc   : > { %v855_v42 = vmul.f32 %v4164_v39, %v817_v41  ;;  %v1330_v43 = vunpack.c.l.b16 %v1270_v35  ;;  %v4204_v46 = vunpack.c.l.b16 %v1047_v38  ;;  %v1017_v35 = vld [vmem:[#allocation2 + $0x7] sm:$0xff] }
  0xbd   : > { %v1041_v44 = vpack.c.bf16 %v1017_v35, %v1017_v35 }
  0xbe   : > { %v875_v49 = vadd.f32 %v4169_v40, %v855_v42  ;;  %v1350_v50 = vpack.c.b16 %v1330_v43, %v1329_v36  ;;  %v1156_v52 = vpack.c.b16 %v4204_v46, %v4206_v48  ;;  %v1379_v14 = vpack.c.b16 %v4202_v45, %v1330_v43  ;;  %v1018_v36 = vld [vmem:[#allocation2 + $0xf] sm:$0xff] }
  0xbf   : > { %v1042_v47 = vpack.c.bf16 %v1018_v36, %v1018_v36  ;;  %v1101_v54 = vunpack.c.l.b16 %v1041_v44 }
  0xc0   : > { %v891_v53 = vmax.f32 %v875_v49, 0.0  ;;  %1627 = vmatmul.bf16.vlgmr.msra.gmra.mxu3 %v1350_v50  ;;  %1680 = vmatmul.bf16.gmra.mxu1 %v1378_v51 }
  0xc1   : > { %1736 = vmatmul.bf16.vlgmr.msrb.gmra.mxu2 %v1350_v50  ;;  %v1024_v55 = vld [vmem:[#allocation2 + $0x3f] sm:$0xff]  ;;  %v1025_v56 = vld [vmem:[#allocation2 + $0x47] sm:$0xff] }
  0xc2   : > { %907 = vst [vmem:[#allocation2 + $0x50] sm:$0xff] %v891_v53  ;;  %v1048_v57 = vpack.c.bf16 %v1024_v55, %v1024_v55  ;;  %v1049_v58 = vpack.c.bf16 %v1025_v56, %v1025_v56  ;;  %v1272_v61 = vpack.c.bf16 %v891_v53, %v891_v53  ;;  %v1102_v55 = vunpack.c.l.b16 %v1042_v47 }
  0xc3   : > { %v819_v59 = vpop.f32.mrf.mxu0 }
  0xc4   : > { %v856_v60 = vmul.f32 %v4164_v39, %v819_v59  ;;  %v4213_v63 = vunpack.c.l.b16 %v1048_v57  ;;  %v4215_v0 = vunpack.c.l.b16 %v1049_v58  ;;  %v1332_v7 = vunpack.c.l.b16 %v1272_v61 }
  0xc6   : > { %v876_v1 = vadd.f32 %v4169_v40, %v856_v60  ;;  %v1157_v2 = vpack.c.b16 %v4215_v0, %v4213_v63  ;;  %v1351_v11 = vpack.c.b16 %v1332_v7, %v4202_v45 }
  0xc8   : > { %v892_v5 = vmax.f32 %v876_v1, 0.0 }
  0xc9   : > { %1619 = vmatmul.bf16.gmra.mxu0 %v1348_v6  ;;  %v1026_v12 = vld [vmem:[#allocation2 + $0x4f] sm:$0xff] }
  0xca   : > { %908 = vst [vmem:[#allocation2 + $0x58] sm:$0xff] %v892_v5  ;;  %v1050_v16 = vpack.c.bf16 %v1026_v12, %v1026_v12  ;;  %v1273_v27 = vpack.c.bf16 %v892_v5, %v892_v5  ;;  %v1125_v5 = vpack.c.b16 %v1102_v55, %v1101_v54 }
  0xcb   : > { %v822_v9 = vpop.f32.mrf.mxu0 }
  0xcc   : > { %v857_v10 = vmul.f32 %v4164_v39, %v822_v9  ;;  %v4227_v22 = vunpack.c.l.b16 %v1050_v16  ;;  %v1333_v34 = vunpack.c.l.b16 %v1273_v27 }
  0xce   : > { %v877_v13 = vadd.f32 %v4169_v40, %v857_v10  ;;  %v1352_v4 = vpack.c.b16 %v4202_v45, %v1333_v34  ;;  %v1380_v50 = vpack.c.b16 %v1333_v34, %v1332_v7 }
  0xd0   : > { %v893_v15 = vmax.f32 %v877_v13, 0.0  ;;  %1632 = vmatmul.bf16.gmra.mxu3 %v1351_v11  ;;  %1684 = vmatmul.bf16.gmra.mxu1 %v1379_v14  ;;  %v3736_v13 = vld [vmem:[#allocation3 + $0x58] sm:$0xff] }
  0xd1   : > { %1741 = vmatmul.bf16.gmra.mxu2 %v1351_v11  ;;  %v1027_v3 = vld [vmem:[#allocation2 + $0x57] sm:$0xff]  ;;  %v1028_v25 = vld [vmem:[#allocation2 + $0x5f] sm:$0xff]  ;;  %1998 = vmatpush.bf16.msrb.mxu3 %v3736_v13 }
  0xd2   : > { %909 = vst [vmem:[#allocation2 + $0x68] sm:$0xff] %v893_v15  ;;  %v1051_v18 = vpack.c.bf16 %v1027_v3, %v1027_v3  ;;  %v1052_v32 = vpack.c.bf16 %v1028_v25, %v1028_v25  ;;  %v1275_v7 = vpack.c.bf16 %v893_v15, %v893_v15  ;;  %v1019_v3 = vld [vmem:[#allocation2 + $0x17] sm:$0xff] }
  0xd3   : > { %v824_v20 = vpop.f32.mrf.mxu0 }
  0xd4   : > { %v858_v21 = vmul.f32 %v4164_v39, %v824_v20  ;;  %v4229_v24 = vunpack.c.l.b16 %v1051_v18  ;;  %v4237_v42 = vunpack.c.l.b16 %v1052_v32  ;;  %v1335_v11 = vunpack.c.l.b16 %v1275_v7 }
  0xd6   : > { %v878_v26 = vadd.f32 %v4169_v40, %v858_v21  ;;  %v1158_v28 = vpack.c.b16 %v4229_v24, %v4227_v22  ;;  %v1381_v20 = vpack.c.b16 %v1335_v11, %v4202_v45  ;;  %v1043_v21 = vpack.c.bf16 %v1019_v3, %v1019_v3 }
  0xd8   : > { %v894_v30 = vmax.f32 %v878_v26, 0.0 }
  0xd9   : > { %v1029_v33 = vld [vmem:[#allocation2 + $0x67] sm:$0xff]  ;;  %1623 = vmatmul.bf16.gmra.mxu0 %v1349_v31  ;;  %v1103_v31 = vunpack.c.l.b16 %v1043_v21 }
  0xda   : > { %910 = vst [vmem:[#allocation2 + $0x70] sm:$0xff] %v894_v30  ;;  %v1053_v37 = vpack.c.bf16 %v1029_v33, %v1029_v33  ;;  %v1276_v8 = vpack.c.bf16 %v894_v30, %v894_v30 }
  0xdb   : > { %v827_v38 = vpop.f32.mrf.mxu0  ;;  %v1126_v47 = vpack.c.b16 %v4193_v19, %v1103_v31 }
  0xdc   : > { %v859_v41 = vmul.f32 %v4164_v39, %v827_v38  ;;  %v4239_v43 = vunpack.c.l.b16 %v1053_v37  ;;  %v1336_v12 = vunpack.c.l.b16 %v1276_v8 }
  0xde   : > { %v879_v49 = vadd.f32 %v4169_v40, %v859_v41  ;;  %v1159_v51 = vpack.c.b16 %v4239_v43, %v4237_v42  ;;  %v1353_v18 = vpack.c.b16 %v1336_v12, %v1335_v11 }
  0xe0   : > { %v895_v53 = vmax.f32 %v879_v49, 0.0  ;;  %1636 = vmatmul.bf16.gmra.mxu3 %v1352_v4  ;;  %1688 = vmatmul.bf16.gmra.mxu1 %v1380_v50 }
  0xe1   : > { %1745 = vmatmul.bf16.gmra.mxu2 %v1352_v4  ;;  %v1030_v56 = vld [vmem:[#allocation2 + $0x6f] sm:$0xff]  ;;  %v1031_v57 = vld [vmem:[#allocation2 + $0x77] sm:$0xff] }
  0xe2   : > { %911 = vst [vmem:[#allocation2 + $0x80] sm:$0xff] %v895_v53  ;;  %v1054_v58 = vpack.c.bf16 %v1030_v56, %v1030_v56  ;;  %v1055_v59 = vpack.c.bf16 %v1031_v57, %v1031_v57  ;;  %v1278_v35 = vpack.c.bf16 %v895_v53, %v895_v53  ;;  %v3735_v53 = vld [vmem:[#allocation3 + $0x50] sm:$0xff] }
  0xe3   : > { %v829_v60 = vpop.f32.mrf.mxu0  ;;  %1999 = vmatpush.bf16.msrb.mxu3 %v3735_v53 }
  0xe4   : > { %v860_v61 = vmul.f32 %v4164_v39, %v829_v60  ;;  %v4246_v62 = vunpack.c.l.b16 %v1054_v58  ;;  %v4248_v1 = vunpack.c.l.b16 %v1055_v59  ;;  %v1338_v4 = vunpack.c.l.b16 %v1278_v35 }
  0xe5   : > { %v1382_v60 = vpack.c.b16 %v4202_v45, %v1336_v12 }
  0xe6   : > { %v880_v6 = vadd.f32 %v4169_v40, %v860_v61  ;;  %v1160_v9 = vpack.c.b16 %v4248_v1, %v4246_v62  ;;  %v1354_v57 = vpack.c.b16 %v1338_v4, %v4202_v45 }
  0xe8   : > { %v4253_v10 = vmax.f32 %v880_v6, 0.0 }
  0xe9   : > { %1941 = vmatmul.bf16.vlgmr.msra.gmra.mxu0 %v1125_v5  ;;  %v1032_v17 = vld [vmem:[#allocation2 + $0x7f] sm:$0xff] }
  0xea   : > { %912 = vst [vmem:[#allocation2 + $0x88] sm:$0xff] %v4253_v10  ;;  %v1056_v26 = vpack.c.bf16 %v1032_v17, %v1032_v17  ;;  %v1279_v17 = vpack.c.bf16 %v4253_v10, %v4253_v10 }
  0xeb   : > { %v832_v14 = vpop.f32.mrf.mxu0 }
  0xec   : > { %v861_v16 = vmul.f32 %v4164_v39, %v832_v14  ;;  %v4263_v36 = vunpack.c.l.b16 %v1056_v26  ;;  %v1339_v26 = vunpack.c.l.b16 %v1279_v17 }
  0xee   : > { %v881_v15 = vadd.f32 %v4169_v40, %v861_v16  ;;  %v1355_v10 = vpack.c.b16 %v4202_v45, %v1339_v26  ;;  %v4380_v19 = vpack.c.b16 %v4263_v36, %v4248_v1 }
  0xf0   : > { %v4259_v25 = vmax.f32 %v881_v15, 0.0  ;;  %1640 = vmatmul.bf16.gmra.mxu3 %v1353_v18  ;;  %1693 = vmatmul.bf16.gmra.mxu1 %v1381_v20  ;;  %v1127_v20 = vpack.c.b16 %v4206_v48, %v4196_v23  ;;  %v3786_v48 = vld [vmem:[#allocation3 + $0x1e8] sm:$0xff] }
  0xf1   : > { %1749 = vmatmul.bf16.gmra.mxu2 %v1353_v18  ;;  %v1033_v27 = vld [vmem:[#allocation2 + $0x87] sm:$0xff]  ;;  %v1034_v33 = vld [vmem:[#allocation2 + $0x8f] sm:$0xff] }
  0xf2   : > { %913 = vst [vmem:[#allocation2 + $0x98] sm:$0xff] %v4259_v25  ;;  %v1057_v30 = vpack.c.bf16 %v1033_v27, %v1033_v27  ;;  %v1058_v41 = vpack.c.bf16 %v1034_v33, %v1034_v33  ;;  %v3734_v27 = vld [vmem:[#allocation3 + $0x48] sm:$0xff]  ;;  %v1281_v53 = vpack.c.bf16 %v4259_v25, %v4259_v25 }
  0xf3   : > { %v834_v32 = vpop.f32.mrf.mxu0  ;;  %2000 = vmatpush.bf16.msrb.mxu3 %v3734_v27 }
  0xf4   : > { %v862_v34 = vmul.f32 %v4164_v39, %v834_v32  ;;  %v4265_v37 = vunpack.c.l.b16 %v1057_v30  ;;  %v4274_v54 = vunpack.c.l.b16 %v1058_v41  ;;  %v1383_v32 = vpack.c.b16 %v1339_v26, %v1338_v4 }
  0xf6   : > { %v882_v38 = vadd.f32 %v4169_v40, %v862_v34  ;;  %v1161_v44 = vpack.c.b16 %v4265_v37, %v4263_v36 }
  0xf8   : > { %v4271_v49 = vmax.f32 %v882_v38, 0.0 }
  0xf9   : > { %v1035_v50 = vld [vmem:[#allocation2 + $0x97] sm:$0xff]  ;;  %1946 = vmatmul.bf16.gmra.mxu0 %v1126_v47  ;;  %v3879_v47 = vld [vmem:[%s4934_s4] ss:$0 sm:$0xff] }
  0xfa   : > { %914 = vst [vmem:[#allocation2 + $0xa0] sm:$0xff] %v4271_v49  ;;  %v1059_v55 = vpack.c.bf16 %v1035_v50, %v1035_v50 }
  0xfb   : > { %v837_v56 = vpop.f32.mrf.mxu0 }
  0xfc   : > { %v863_v58 = vmul.f32 %v4164_v39, %v837_v56  ;;  %v4278_v59 = vunpack.c.l.b16 %v1059_v55  ;;  %v1282_v55 = vpack.c.bf16 %v4271_v49, %v4271_v49 }
  0xfe   : > { %v883_v61 = vadd.f32 %v4169_v40, %v863_v58  ;;  %v1162_v5 = vpack.c.b16 %v4278_v59, %v4274_v54  ;;  %v1342_v49 = vunpack.c.l.b16 %v1282_v55 }
 0x100   : > { %1645 = vmatmul.bf16.gmra.mxu3 %v1354_v57  ;;  %1697 = vmatmul.bf16.gmra.mxu1 %v1382_v60  ;;  %v4284_v6 = vmax.f32 %v883_v61, 0.0  ;;  %v991_v60 = vpop.f32.mrf.mxu2 }
 0x101   : > { %1754 = vmatmul.bf16.gmra.mxu2 %v1354_v57  ;;  %v1036_v7 = vld [vmem:[#allocation2 + $0x9f] sm:$0xff]  ;;  %v1037_v11 = vld [vmem:[#allocation2 + $0xa7] sm:$0xff] }
 0x102   : > { %915 = vst [vmem:[#allocation2 + $0xb0] sm:$0xff] %v4284_v6  ;;  %v1060_v8 = vpack.c.bf16 %v1036_v7, %v1036_v7  ;;  %v1061_v14 = vpack.c.bf16 %v1037_v11, %v1037_v11  ;;  %v3880_v57 = vld [vmem:[%s4935_s5] ss:$0 sm:$0xff]  ;;  %v1000_v7 = vmul.f32 %v3879_v47, %v991_v60 }
 0x103   : > { %v839_v13 = vpop.f32.mrf.mxu0 }
 0x104   : > { %v864_v16 = vmul.f32 %v4164_v39, %v839_v13  ;;  %v4288_v12 = vunpack.c.l.b16 %v1060_v8  ;;  %v4290_v3 = vunpack.c.l.b16 %v1061_v14  ;;  %v1006_v11 = vadd.f32 %v3880_v57, %v1000_v7 }
 0x105   : > { %v1012_v14 = vstv %s1011_s18  ;;  %v4355_v7 = vpack.c.b16 %v4237_v42, %v4229_v24 }
 0x106   : > { %v884_v15 = vadd.f32 %v4169_v40, %v864_v16  ;;  %v1163_v18 = vpack.c.b16 %v4290_v3, %v4288_v12  ;;  %v1008_v16 = vmax.f32 %v1006_v11, 0.0  ;;  %v3746_v11 = vld [vmem:[#allocation3 + $0xa8] sm:$0xff] }
 0x108   : > { %v4299_v21 = vmax.f32 %v884_v15, 0.0  ;;  %v993_v26 = vpop.f32.mrf.mxu2 }
 0x109   : > { %1950 = vmatmul.bf16.gmra.mxu0 %v1127_v20  ;;  %v1038_v35 = vld [vmem:[#allocation2 + $0xaf] sm:$0xff]  ;;  %v4336_v20 = vmul.f32 %v1012_v14, %v1008_v16  ;;  %v1001_v27 = vmul.f32 %v3879_v47, %v993_v26 }
 0x10a   : > { %916 = vst [vmem:[#allocation2 + $0xb8] sm:$0xff] %v4299_v21  ;;  %v1062_v50 = vpack.c.bf16 %v1038_v35, %v1038_v35  ;;  %v4345_v35 = vpack.c.b16 %v4227_v22, %v4215_v0  ;;  %v3784_v0 = vld [vmem:[#allocation3 + $0x1d8] sm:$0xff] }
 0x10b   : > { %v842_v30 = vpop.f32.mrf.mxu0  ;;  %1015 = vst [vmem:[#allocation2 + $0xe0] sm:$0xff] %v4336_v20 }
 0x10c   : > { %v865_v31 = vmul.f32 %v4164_v39, %v842_v30  ;;  %v4327_v25 = vunpack.c.l.b16 %v1062_v50  ;;  %v3733_v30 = vld [vmem:[#allocation3 + $0x40] sm:$0xff]  ;;  %v1385_v50 = vpack.c.b16 %v4202_v45, %v1342_v49 }
 0x10d   : > { %2001 = vmatpush.bf16.msrb.mxu3 %v3733_v30 }
 0x10e   : > { %v885_v33 = vadd.f32 %v4169_v40, %v865_v31  ;;  %v1007_v31 = vadd.f32 %v3880_v57, %v1001_v27  ;;  %v3744_v27 = vld [vmem:[#allocation3 + $0x98] sm:$0xff] }
 0x110   : > { %1649 = vmatmul.bf16.gmra.mxu3 %v1355_v10  ;;  %1701 = vmatmul.bf16.gmra.mxu1 %v1383_v32  ;;  %v4305_v34 = vmax.f32 %v885_v33, 0.0  ;;  %v1009_v32 = vmax.f32 %v1007_v31, 0.0 }
 0x111   : > { %1758 = vmatmul.bf16.gmra.mxu2 %v1355_v10  ;;  %v1039_v4 = vld [vmem:[#allocation2 + $0xb7] sm:$0xff]  ;;  %v1284_v10 = vpack.c.bf16 %v4284_v6, %v4284_v6 }
 0x112   : > { %917 = vst [vmem:[#allocation2 + $0xc8] sm:$0xff] %v4305_v34  ;;  %v1063_v58 = vpack.c.bf16 %v1039_v4, %v1039_v4  ;;  %v4341_v33 = vmul.f32 %v1012_v14, %v1009_v32  ;;  %v3780_v6 = vld [vmem:[#allocation3 + $0x1b8] sm:$0xff] }
 0x113   : > { %v844_v38 = vpop.f32.mrf.mxu0  ;;  %v3796_v4 = vld [vmem:[#allocation3 + $0x238] sm:$0xff]  ;;  %2483 = vmatpush.bf16.msra.mxu2 %v3780_v6  ;;  %v3779_v6 = vld [vmem:[#allocation3 + $0x1b0] sm:$0xff] }
 0x114   : > { %v866_v41 = vmul.f32 %v4164_v39, %v844_v38  ;;  %v4323_v39 = vpack.c.b16 %v4213_v63, %v4204_v46  ;;  %v4329_v8 = vunpack.c.l.b16 %v1063_v58  ;;  %v1344_v38 = vunpack.c.l.b16 %v1284_v10  ;;  %1016 = vst [vmem:[#allocation2 + $0xe8] sm:$0xff] %v4341_v33  ;;  %2605 = vmatpush.bf16.msra.mxu3 %v3796_v4  ;;  %v3747_v58 = vld [vmem:[#allocation3 + $0xb0] sm:$0xff] }
 0x115   : > { %v1290_v10 = vpack.c.bf16 %v4305_v34, %v4305_v34  ;;  %v4367_v4 = vpack.c.b16 %v4246_v62, %v4239_v43  ;;  %v3795_v34 = vld [vmem:[#allocation3 + $0x230] sm:$0xff]  ;;  %v4399_v46 = vpack.c.b16 %v4274_v54, %v4265_v37  ;;  %v4414_v63 = vpack.c.b16 %v4288_v12, %v4278_v59  ;;  %v3789_v12 = vld [vmem:[#allocation3 + $0x200] sm:$0xff] }
 0x116   : > { %v886_v56 = vadd.f32 %v4169_v40, %v866_v41  ;;  %v1341_v40 = vunpack.c.l.b16 %v1281_v53  ;;  %v1164_v13 = vpack.c.b16 %v4329_v8, %v4327_v25  ;;  %v1357_v41 = vpack.c.b16 %v1344_v38, %v4202_v45  ;;  %v3748_v53 = vld [vmem:[#allocation3 + $0xb8] sm:$0xff] }
 0x117   : > { %2055 = vmatpush.bf16.msra.mxu1 %v3748_v53  ;;  %v1374_v53 = vunpack.c.l.b16 %v1290_v10  ;;  %2484 = vmatpush.bf16.msra.mxu2 %v3779_v6 }
 0x118   : > { %v4325_v61 = vmax.f32 %v886_v56, 0.0  ;;  %v1356_v17 = vpack.c.b16 %v1342_v49, %v1341_v40  ;;  %v1384_v15 = vpack.c.b16 %v1341_v40, %v4202_v45  ;;  %v1285_v56 = vpack.c.bf16 %v4299_v21, %v4299_v21  ;;  %v3788_v40 = vld [vmem:[#allocation3 + $0x1f8] sm:$0xff]  ;;  %2606 = vmatpush.bf16.msra.mxu3 %v3795_v34 }
 0x119   : > { %1954 = vmatmul.bf16.gmra.mxu0 %v4323_v39 }
 0x11a   : > { %918 = vst [vmem:[#allocation2 + $0xd0] sm:$0xff] %v4325_v61  ;;  %v1345_v49 = vunpack.c.l.b16 %v1285_v56  ;;  %2544 = vmatpush.bf16.msrb.mxu0 %v3788_v40  ;;  %v3742_v56 = vld [vmem:[#allocation3 + $0x88] sm:$0xff] }
 0x11b   : > { %2056 = vmatpush.bf16.msra.mxu1 %v3747_v58 }
 0x11c   : > { %v1358_v16 = vpack.c.b16 %v4202_v45, %v1345_v49 }
 0x11f   : > { %2057 = vmatpush.bf16.msra.mxu1 %v3746_v11 }
 0x120   : > { %1653 = vmatmul.bf16.gmra.mxu3 %v1356_v17  ;;  %1706 = vmatmul.bf16.gmra.mxu1 %v1384_v15  ;;  %v3745_v15 = vld [vmem:[#allocation3 + $0xa0] sm:$0xff] }
 0x121   : > { %1762 = vmatmul.bf16.gmra.mxu2 %v1356_v17  ;;  %v1386_v17 = vpack.c.b16 %v1345_v49, %v1344_v38 }
 0x123   : > { %2058 = vmatpush.bf16.msra.mxu1 %v3745_v15  ;;  %v3787_v15 = vld [vmem:[#allocation3 + $0x1f0] sm:$0xff] }
 0x124   : > { %2545 = vmatpush.bf16.msrb.mxu0 %v3787_v15 }
 0x127   : > { %2059 = vmatpush.bf16.msra.mxu1 %v3744_v27 }
 0x128   : > { %2546 = vmatpush.bf16.msrb.mxu0 %v3786_v48  ;;  %v3782_v48 = vld [vmem:[#allocation3 + $0x1c8] sm:$0xff] }
 0x129   : > { %1959 = vmatmul.bf16.gmra.mxu0 %v4345_v35 }
 0x12d   : > { %v1676_v47 = vpop.f32.mrf.mxu1 }
 0x130   : > { %1658 = vmatmul.bf16.gmra.mxu3 %v1357_v41  ;;  %1710 = vmatmul.bf16.gmra.mxu1 %v1385_v50  ;;  %v3743_v50 = vld [vmem:[#allocation3 + $0x90] sm:$0xff] }
 0x131   : > { %1767 = vmatmul.bf16.gmra.mxu2 %v1357_v41  ;;  %2060 = vmatpush.bf16.msra.mxu1 %v3743_v50 }
 0x135   : > { %v1678_v55 = vpop.f32.mrf.mxu1  ;;  %2061 = vmatpush.bf16.msra.mxu1 %v3742_v56 }
 0x136   : > { %v1615_v57 = vpop.f32.mrf.mxu0 }
 0x137   : > { %v1677_v60 = vadd.f32 %v1676_v47, %v1615_v57  ;;  %v1291_v47 = vpack.c.bf16 %v4325_v61, %v4325_v61  ;;  %v3778_v57 = vld [vmem:[#allocation3 + $0x1a8] sm:$0xff]  ;;  %v1387_v61 = vpack.c.b16 %v1374_v53, %v4202_v45 }
 0x138   : > { %2485 = vmatpush.bf16.msra.mxu2 %v3778_v57 }
 0x139   : > { %1963 = vmatmul.bf16.gmra.mxu0 %v4355_v7 }
 0x13d   : > { %v1681_v14 = vpop.f32.mrf.mxu1 }
 0x13e   : > { %v1617_v21 = vpop.f32.mrf.mxu0 }
 0x13f   : > { %v1679_v26 = vadd.f32 %v1678_v55, %v1617_v21  ;;  %v1375_v55 = vunpack.c.l.b16 %v1291_v47  ;;  %v1296_v47 = vpack.c.bf16 %v4336_v20, %v4336_v20 }
 0x140   : > { %1662 = vmatmul.bf16.gmra.mxu3 %v1358_v16  ;;  %1714 = vmatmul.bf16.gmra.mxu1 %v1386_v17  ;;  %v3777_v17 = vld [vmem:[#allocation3 + $0x1a0] sm:$0xff] }
 0x141   : > { %1771 = vmatmul.bf16.gmra.mxu2 %v1358_v16  ;;  %v1407_v11 = vpack.c.b16 %v1375_v55, %v1374_v53  ;;  %v3741_v16 = vld [vmem:[#allocation3 + $0x80] sm:$0xff]  ;;  %v1404_v23 = vunpack.c.l.b16 %v1296_v47  ;;  %v1388_v34 = vpack.c.b16 %v4202_v45, %v1375_v55 }
 0x142   : > { %2062 = vmatpush.bf16.msra.mxu1 %v3741_v16  ;;  %2486 = vmatpush.bf16.msra.mxu2 %v3777_v17 }
 0x143   : > { %v1628_v30 = vpop.f32.mrf.mxu3  ;;  %v1408_v57 = vpack.c.b16 %v1404_v23, %v4202_v45 }
 0x144   : > { %v1737_v31 = vpop.f32.mrf.mxu2 }
 0x145   : > { %v4361_v32 = vadd.f32 %v1737_v31, %v1677_v60  ;;  %v1682_v41 = vpop.f32.mrf.mxu1 }
 0x146   : > { %v1620_v38 = vpop.f32.mrf.mxu0 }
 0x149   : > { %1967 = vmatmul.bf16.gmra.mxu0 %v4367_v4 }
 0x14b   : > { %v1630_v58 = vpop.f32.mrf.mxu3 }
 0x14c   : > { %v1739_v60 = vpop.f32.mrf.mxu2 }
 0x14d   : > { %v4371_v40 = vadd.f32 %v1739_v60, %v1679_v26  ;;  %v1685_v49 = vpop.f32.mrf.mxu1  ;;  %v3776_v26 = vld [vmem:[#allocation3 + $0x198] sm:$0xff] }
 0x14e   : > { %v1621_v14 = vpop.f32.mrf.mxu0  ;;  %2487 = vmatpush.bf16.msra.mxu2 %v3776_v26 }
 0x14f   : > { %v1683_v21 = vadd.f32 %v1682_v41, %v1621_v14  ;;  %v3775_v41 = vld [vmem:[#allocation3 + $0x190] sm:$0xff] }
 0x150   : > { %1719 = vmatmul.bf16.gmra.mxu1 %v1387_v61  ;;  %2002 = vmatmul.bf16.vlgmr.msrb.gmra.mxu3 %v1155_v29  ;;  %v3774_v29 = vld [vmem:[#allocation3 + $0x188] sm:$0xff] }
 0x151   : > { %1775 = vmatmul.bf16.gmra.mxu2 %v1407_v11  ;;  %v3794_v11 = vld [vmem:[#allocation3 + $0x228] sm:$0xff] }
 0x152   : > { %2488 = vmatpush.bf16.msra.mxu2 %v3775_v41  ;;  %2607 = vmatpush.bf16.msra.mxu3 %v3794_v11  ;;  %v2116_v41 = vld [vmem:[#allocation2 + $0x9] sm:$0xff] }
 0x153   : > { %v1633_v27 = vpop.f32.mrf.mxu3  ;;  %v3783_v11 = vld [vmem:[#allocation3 + $0x1d0] sm:$0xff] }
 0x154   : > { %v1742_v31 = vpop.f32.mrf.mxu2 }
 0x155   : > { %v1687_v10 = vpop.f32.mrf.mxu1 }
 0x156   : > { %v1624_v38 = vpop.f32.mrf.mxu0  ;;  %2489 = vmatpush.bf16.msra.mxu2 %v3774_v29 }
 0x157   : > { %v1686_v50 = vadd.f32 %v1685_v49, %v1624_v38  ;;  %v3773_v49 = vld [vmem:[#allocation3 + $0x180] sm:$0xff] }
 0x159   : > { %1972 = vmatmul.bf16.gmra.mxu0 %v4380_v19 }
 0x15a   : > { %2490 = vmatpush.bf16.msra.mxu2 %v3773_v49 }
 0x15b   : > { %v1634_v6 = vpop.f32.mrf.mxu3 }
 0x15c   : > { %v1743_v53 = vpop.f32.mrf.mxu2 }
 0x15d   : > { %v4384_v56 = vadd.f32 %v1743_v53, %v1683_v21  ;;  %v1689_v20 = vpop.f32.mrf.mxu1  ;;  %v3785_v53 = vld [vmem:[#allocation3 + $0x1e0] sm:$0xff] }
 0x15e   : > { %v1690_v60 = vadd.f32 %v1689_v20, %v1628_v30  ;;  %v1626_v61 = vpop.f32.mrf.mxu0  ;;  %v1297_v30 = vpack.c.bf16 %v4341_v33, %v4341_v33  ;;  %v2140_v20 = vpack.c.bf16 %v2116_v41, %v2116_v41  ;;  %2547 = vmatpush.bf16.msrb.mxu0 %v3785_v53 }
 0x160   : > { %1723 = vmatmul.bf16.gmra.mxu1 %v1388_v34  ;;  %2007 = vmatmul.bf16.gmra.mxu3 %v1156_v52  ;;  %v1405_v52 = vunpack.c.l.b16 %v1297_v30 }
 0x161   : > { %1780 = vmatmul.bf16.gmra.mxu2 %v1408_v57  ;;  %v2200_v57 = vunpack.c.l.b16 %v2140_v20 }
 0x162   : > { %v1409_v47 = vpack.c.b16 %v4202_v45, %v1405_v52  ;;  %2548 = vmatpush.bf16.msrb.mxu0 %v3784_v0 }
 0x163   : > { %v1637_v14 = vpop.f32.mrf.mxu3 }
 0x164   : > { %v1746_v55 = vpop.f32.mrf.mxu2 }
 0x165   : > { %v4390_v16 = vadd.f32 %v1746_v55, %v1686_v50  ;;  %v1691_v17 = vpop.f32.mrf.mxu1  ;;  %v2117_v50 = vld [vmem:[#allocation2 + $0x11] sm:$0xff] }
 0x166   : > { %v1692_v21 = vadd.f32 %v1691_v17, %v1630_v58  ;;  %v1942_v15 = vpop.f32.mrf.mxu0  ;;  %2549 = vmatpush.bf16.msrb.mxu0 %v3783_v11 }
 0x167   : > { %v4395_v26 = vadd.f32 %v1942_v15, %v4361_v32 }
 0x169   : > { %1976 = vmatmul.bf16.gmra.mxu0 %v4399_v46 }
 0x16a   : > { %2550 = vmatpush.bf16.msrb.mxu0 %v3782_v48 }
 0x16b   : > { %v1639_v27 = vpop.f32.mrf.mxu3 }
 0x16c   : > { %v1748_v31 = vpop.f32.mrf.mxu2  ;;  %v2119_v27 = vld [vmem:[#allocation2 + $0x21] sm:$0xff] }
 0x16d   : > { %v1694_v10 = vpop.f32.mrf.mxu1  ;;  %v2164_v31 = vld [vmem:[#allocation2 + $0xc9] sm:$0xff] }
 0x16e   : > { %v1944_v33 = vpop.f32.mrf.mxu0 }
 0x16f   : > { %v4404_v58 = vadd.f32 %v1944_v33, %v4371_v40  ;;  %v2141_v40 = vpack.c.bf16 %v2117_v50, %v2117_v50  ;;  %v2167_v33 = vpack.c.bf16 %v2164_v31, %v2164_v31  ;;  %v2143_v50 = vpack.c.bf16 %v2119_v27, %v2119_v27  ;;  %v2120_v31 = vld [vmem:[#allocation2 + $0x29] sm:$0xff] }
 0x170   : > { %2011 = vmatmul.bf16.gmra.mxu3 %v1157_v2  ;;  %2063 = vmatmul.bf16.vlgmr.msra.gmra.mxu1 %v4323_v39  ;;  %v3793_v2 = vld [vmem:[#allocation3 + $0x220] sm:$0xff] }
 0x171   : > { %1784 = vmatmul.bf16.gmra.mxu2 %v1409_v47  ;;  %v2201_v61 = vunpack.c.l.b16 %v2141_v40  ;;  %2608 = vmatpush.bf16.msra.mxu3 %v3793_v2  ;;  %v3781_v47 = vld [vmem:[#allocation3 + $0x1c0] sm:$0xff]  ;;  %v4426_v22 = vunpack.c.l.b16 %v2167_v33  ;;  %v2203_v20 = vunpack.c.l.b16 %v2143_v50 }
 0x172   : > { %2551 = vmatpush.bf16.msrb.mxu0 %v3781_v47 }
 0x173   : > { %v1641_v32 = vpop.f32.mrf.mxu3  ;;  %v2224_v30 = vpack.c.b16 %v2201_v61, %v2200_v57  ;;  %v1040_v61 = vld [vmem:[#allocation2 + $0xbf] sm:$0xff] }
 0x174   : > { %v1750_v38 = vpop.f32.mrf.mxu2  ;;  %v1064_v11 = vpack.c.bf16 %v1040_v61, %v1040_v61 }
 0x175   : > { %v4410_v23 = vadd.f32 %v1750_v38, %v1690_v60  ;;  %v1695_v29 = vpop.f32.mrf.mxu1 }
 0x176   : > { %v1696_v45 = vadd.f32 %v1695_v29, %v1634_v6  ;;  %v1947_v34 = vpop.f32.mrf.mxu0 }
 0x179   : > { %1980 = vmatmul.bf16.gmra.mxu0 %v4414_v63 }
 0x17b   : > { %v1643_v39 = vpop.f32.mrf.mxu3 }
 0x17c   : > { %v1752_v60 = vpop.f32.mrf.mxu2 }
 0x17d   : > { %v4417_v49 = vadd.f32 %v1752_v60, %v1692_v21  ;;  %v1698_v6 = vpop.f32.mrf.mxu1 }
 0x17e   : > { %v1699_v55 = vadd.f32 %v1698_v6, %v1637_v14  ;;  %v1948_v17 = vpop.f32.mrf.mxu0  ;;  %v2165_v14 = vld [vmem:[#allocation2 + $0xd1] sm:$0xff] }
 0x17f   : > { %v4420_v15 = vadd.f32 %v1948_v17, %v4384_v56  ;;  %v2168_v38 = vpack.c.bf16 %v2165_v14, %v2165_v14  ;;  %v2118_v56 = vld [vmem:[#allocation2 + $0x19] sm:$0xff] }
 0x180   : > { %2015 = vmatmul.bf16.gmra.mxu3 %v1158_v28  ;;  %2068 = vmatmul.bf16.gmra.mxu1 %v4345_v35  ;;  %v4435_v35 = vpack.c.b16 %v4327_v25, %v4290_v3  ;;  %v2142_v29 = vpack.c.bf16 %v2118_v56, %v2118_v56  ;;  %v3792_v17 = vld [vmem:[#allocation3 + $0x218] sm:$0xff] }
 0x181   : > { %2491 = vmatmul.bf16.vlgmr.msra.gmra.mxu2 %v2224_v30  ;;  %v4428_v24 = vunpack.c.l.b16 %v2168_v38  ;;  %2609 = vmatpush.bf16.msra.mxu3 %v3792_v17 }
 0x182   : > { %v2202_v57 = vunpack.c.l.b16 %v2142_v29  ;;  %v2122_v29 = vld [vmem:[#allocation2 + $0x39] sm:$0xff] }
 0x183   : > { %v1646_v52 = vpop.f32.mrf.mxu3  ;;  %v2284_v53 = vpack.c.b16 %v4428_v24, %v4426_v22 }
 0x184   : > { %v1755_v21 = vpop.f32.mrf.mxu2  ;;  %v2225_v6 = vpack.c.b16 %v2203_v20, %v2202_v57  ;;  %v4444_v52 = vunpack.c.l.b16 %v1064_v11 }
 0x185   : > { %v1700_v10 = vpop.f32.mrf.mxu1 }
 0x186   : > { %v1951_v41 = vpop.f32.mrf.mxu0  ;;  %v4451_v43 = vpack.c.b16 %v4444_v52, %v4329_v8 }
 0x187   : > { %v4431_v28 = vadd.f32 %v1951_v41, %v4390_v16 }
 0x189   : > { %1985 = vmatmul.bf16.gmra.mxu0 %v4435_v35 }
 0x18b   : > { %v1647_v34 = vpop.f32.mrf.mxu3 }
 0x18c   : > { %v1756_v40 = vpop.f32.mrf.mxu2 }
 0x18d   : > { %v1757_v0 = vadd.f32 %v1756_v40, %v1696_v45  ;;  %v1702_v2 = vpop.f32.mrf.mxu1  ;;  %v2121_v45 = vld [vmem:[#allocation2 + $0x31] sm:$0xff]  ;;  %v2123_v40 = vld [vmem:[#allocation2 + $0x41] sm:$0xff] }
 0x18e   : > { %v1703_v60 = vadd.f32 %v1702_v2, %v1641_v32  ;;  %v1953_v16 = vpop.f32.mrf.mxu0  ;;  %v2145_v10 = vpack.c.bf16 %v2121_v45, %v2121_v45  ;;  %v2147_v11 = vpack.c.bf16 %v2123_v40, %v2123_v40 }
 0x190   : > { %2020 = vmatmul.bf16.gmra.mxu3 %v1159_v51  ;;  %2072 = vmatmul.bf16.gmra.mxu1 %v4355_v7  ;;  %v2144_v51 = vpack.c.bf16 %v2120_v31, %v2120_v31  ;;  %v2205_v47 = vunpack.c.l.b16 %v2145_v10  ;;  %v2207_v62 = vunpack.c.l.b16 %v2147_v11  ;;  %v2125_v10 = vld [vmem:[#allocation2 + $0x51] sm:$0xff] }
 0x191   : > { %2496 = vmatmul.bf16.gmra.mxu2 %v2225_v6  ;;  %v2146_v6 = vpack.c.bf16 %v2122_v29, %v2122_v29 }
 0x193   : > { %v1650_v30 = vpop.f32.mrf.mxu3  ;;  %v2206_v45 = vunpack.c.l.b16 %v2146_v6 }
 0x194   : > { %v1759_v48 = vpop.f32.mrf.mxu2 }
 0x195   : > { %v1760_v21 = vadd.f32 %v1759_v48, %v1699_v55  ;;  %v1704_v27 = vpop.f32.mrf.mxu1  ;;  %v2204_v55 = vunpack.c.l.b16 %v2144_v51 }
 0x196   : > { %v1705_v32 = vadd.f32 %v1704_v27, %v1643_v39  ;;  %v1955_v14 = vpop.f32.mrf.mxu0 }
 0x197   : > { %v4447_v42 = vadd.f32 %v1955_v14, %v4410_v23  ;;  %v2226_v39 = vpack.c.b16 %v2205_v47, %v2204_v55  ;;  %v2254_v17 = vpack.c.b16 %v2204_v55, %v2203_v20  ;;  %v4461_v14 = vpack.c.b16 %v2207_v62, %v2206_v45 }
 0x199   : > { %1989 = vmatmul.bf16.gmra.mxu0 %v4451_v43 }
 0x19b   : > { %v1652_v7 = vpop.f32.mrf.mxu3 }
 0x19c   : > { %v1761_v33 = vpop.f32.mrf.mxu2 }
 0x19d   : > { %v1707_v38 = vpop.f32.mrf.mxu1 }
 0x19e   : > { %v1957_v56 = vpop.f32.mrf.mxu0  ;;  %v2255_v38 = vpack.c.b16 %v2206_v45, %v2205_v47 }
 0x19f   : > { %v4455_v41 = vadd.f32 %v1957_v56, %v4417_v49  ;;  %v3791_v49 = vld [vmem:[#allocation3 + $0x210] sm:$0xff] }
 0x1a0   : > { %2024 = vmatmul.bf16.gmra.mxu3 %v1160_v9  ;;  %2076 = vmatmul.bf16.gmra.mxu1 %v4367_v4 }
 0x1a1   : > { %2500 = vmatmul.bf16.gmra.mxu2 %v2226_v39  ;;  %2610 = vmatpush.bf16.msra.mxu3 %v3791_v49 }
 0x1a3   : > { %v1654_v23 = vpop.f32.mrf.mxu3 }
 0x1a4   : > { %v1763_v50 = vpop.f32.mrf.mxu2 }
 0x1a5   : > { %v1764_v2 = vadd.f32 %v1763_v50, %v1703_v60  ;;  %v1708_v57 = vpop.f32.mrf.mxu1 }
 0x1a6   : > { %v1709_v61 = vadd.f32 %v1708_v57, %v1647_v34  ;;  %v1960_v16 = vpop.f32.mrf.mxu0  ;;  %v2127_v57 = vld [vmem:[#allocation2 + $0x61] sm:$0xff] }
 0x1a9   : > { %2552 = vmatmul.bf16.vlgmr.msrb.gmra.mxu0 %v2254_v17  ;;  %v2151_v17 = vpack.c.bf16 %v2127_v57, %v2127_v57  ;;  %v2131_v57 = vld [vmem:[#allocation2 + $0x81] sm:$0xff] }
 0x1ab   : > { %v1656_v48 = vpop.f32.mrf.mxu3 }
 0x1ac   : > { %v1765_v1 = vpop.f32.mrf.mxu2 }
 0x1ad   : > { %v1766_v9 = vadd.f32 %v1765_v1, %v1705_v32  ;;  %v1711_v4 = vpop.f32.mrf.mxu1  ;;  %v2124_v32 = vld [vmem:[#allocation2 + $0x49] sm:$0xff] }
 0x1ae   : > { %v1712_v27 = vadd.f32 %v1711_v4, %v1650_v30  ;;  %v1961_v31 = vpop.f32.mrf.mxu0  ;;  %v2149_v30 = vpack.c.bf16 %v2125_v10, %v2125_v10  ;;  %v2129_v10 = vld [vmem:[#allocation2 + $0x71] sm:$0xff] }
 0x1af   : > { %v4463_v60 = vadd.f32 %v1961_v31, %v1757_v0  ;;  %v2148_v0 = vpack.c.bf16 %v2124_v32, %v2124_v32 }
 0x1b0   : > { %2028 = vmatmul.bf16.gmra.mxu3 %v1161_v44  ;;  %2081 = vmatmul.bf16.gmra.mxu1 %v4380_v19  ;;  %v2209_v56 = vunpack.c.l.b16 %v2149_v30 }
 0x1b1   : > { %2504 = vmatmul.bf16.gmra.mxu2 %v4461_v14  ;;  %v2208_v19 = vunpack.c.l.b16 %v2148_v0 }
 0x1b3   : > { %v1659_v34 = vpop.f32.mrf.mxu3  ;;  %v4472_v29 = vpack.c.b16 %v2209_v56, %v2208_v19  ;;  %v2256_v45 = vpack.c.b16 %v2208_v19, %v2207_v62 }
 0x1b4   : > { %v1768_v20 = vpop.f32.mrf.mxu2 }
 0x1b5   : > { %v1713_v51 = vpop.f32.mrf.mxu1 }
 0x1b6   : > { %v1964_v7 = vpop.f32.mrf.mxu0 }
 0x1b7   : > { %v4470_v33 = vadd.f32 %v1964_v7, %v1760_v21  ;;  %v3790_v21 = vld [vmem:[#allocation3 + $0x208] sm:$0xff] }
 0x1b8   : > { %2611 = vmatpush.bf16.msra.mxu3 %v3790_v21 }
 0x1b9   : > { %2557 = vmatmul.bf16.gmra.mxu0 %v2255_v38  ;;  %v2153_v38 = vpack.c.bf16 %v2129_v10, %v2129_v10 }
 0x1bb   : > { %v1660_v55 = vpop.f32.mrf.mxu3 }
 0x1bc   : > { %v1769_v36 = vpop.f32.mrf.mxu2  ;;  %2612 = vmatpush.bf16.msra.mxu3 %v3789_v12 }
 0x1bd   : > { %v1770_v37 = vadd.f32 %v1769_v36, %v1709_v61  ;;  %v1715_v44 = vpop.f32.mrf.mxu1 }
 0x1be   : > { %v1716_v39 = vadd.f32 %v1715_v44, %v1654_v23  ;;  %v1966_v50 = vpop.f32.mrf.mxu0  ;;  %v2126_v23 = vld [vmem:[#allocation2 + $0x59] sm:$0xff] }
 0x1bf   : > { %v2150_v54 = vpack.c.bf16 %v2126_v23, %v2126_v23 }
 0x1c0   : > { %2033 = vmatmul.bf16.gmra.mxu3 %v1162_v5  ;;  %2085 = vmatmul.bf16.gmra.mxu1 %v4399_v46  ;;  %v2211_v5 = vunpack.c.l.b16 %v2151_v17 }
 0x1c1   : > { %2509 = vmatmul.bf16.gmra.mxu2 %v4472_v29  ;;  %v2210_v4 = vunpack.c.l.b16 %v2150_v54 }
 0x1c3   : > { %v1663_v47 = vpop.f32.mrf.mxu3  ;;  %v4481_v34 = vpack.c.b16 %v2211_v5, %v2210_v4  ;;  %v2257_v0 = vpack.c.b16 %v2210_v4, %v2209_v56  ;;  %v1065_v56 = vld [vmem:[#allocation2 + $0xc7] sm:$0xff] }
 0x1c4   : > { %v1772_v40 = vpop.f32.mrf.mxu2 }
 0x1c5   : > { %v1773_v61 = vadd.f32 %v1772_v40, %v1712_v27  ;;  %v1717_v16 = vpop.f32.mrf.mxu1  ;;  %v2128_v27 = vld [vmem:[#allocation2 + $0x69] sm:$0xff] }
 0x1c6   : > { %v1718_v6 = vadd.f32 %v1717_v16, %v1656_v48  ;;  %v1968_v11 = vpop.f32.mrf.mxu0  ;;  %v2152_v30 = vpack.c.bf16 %v2128_v27, %v2128_v27 }
 0x1c7   : > { %v4479_v49 = vadd.f32 %v1968_v11, %v1764_v2  ;;  %v2155_v11 = vpack.c.bf16 %v2131_v57, %v2131_v57 }
 0x1c9   : > { %2561 = vmatmul.bf16.gmra.mxu0 %v2256_v45 }
 0x1cb   : > { %v1665_v59 = vpop.f32.mrf.mxu3 }
 0x1cc   : > { %v1774_v46 = vpop.f32.mrf.mxu2 }
 0x1cd   : > { %v1720_v1 = vpop.f32.mrf.mxu1 }
 0x1ce   : > { %v1970_v31 = vpop.f32.mrf.mxu0 }
 0x1cf   : > { %v4483_v20 = vadd.f32 %v1970_v31, %v1766_v9 }
 0x1d0   : > { %2037 = vmatmul.bf16.gmra.mxu3 %v1163_v18  ;;  %2089 = vmatmul.bf16.gmra.mxu1 %v4414_v63  ;;  %v2212_v18 = vunpack.c.l.b16 %v2152_v30  ;;  %v2213_v63 = vunpack.c.l.b16 %v2153_v38 }
 0x1d1   : > { %2513 = vmatmul.bf16.gmra.mxu2 %v4481_v34 }
 0x1d3   : > { %v2003_v2 = vpop.f32.mrf.mxu3 }
 0x1d4   : > { %v1776_v48 = vpop.f32.mrf.mxu2  ;;  %v2004_v62 = vadd.f32 %v2003_v2, %v4395_v26 }
 0x1d5   : > { %v4491_v51 = vadd.f32 %v1776_v48, %v1716_v39  ;;  %v1721_v32 = vpop.f32.mrf.mxu1  ;;  %v1066_v48 = vld [vmem:[#allocation2 + $0xcf] sm:$0xff] }
 0x1d6   : > { %v1722_v7 = vadd.f32 %v1721_v32, %v1660_v55  ;;  %v1973_v9 = vpop.f32.mrf.mxu0  ;;  %v4498_v55 = vpack.c.b16 %v2213_v63, %v2212_v18  ;;  %v2132_v32 = vld [vmem:[#allocation2 + $0x89] sm:$0xff] }
 0x1d9   : > { %2565 = vmatmul.bf16.gmra.mxu0 %v2257_v0  ;;  %v2156_v0 = vpack.c.bf16 %v2132_v32, %v2132_v32 }
 0x1db   : > { %v2005_v3 = vpop.f32.mrf.mxu3 }
 0x1dc   : > { %v1778_v36 = vpop.f32.mrf.mxu2  ;;  %v4494_v44 = vadd.f32 %v2005_v3, %v4404_v58 }
 0x1dd   : > { %v4496_v26 = vadd.f32 %v1778_v36, %v1718_v6  ;;  %v1724_v19 = vpop.f32.mrf.mxu1  ;;  %v1068_v6 = vpack.c.bf16 %v1065_v56, %v1065_v56 }
 0x1de   : > { %v1725_v39 = vadd.f32 %v1724_v19, %v1663_v47  ;;  %v1974_v50 = vpop.f32.mrf.mxu0  ;;  %v2130_v47 = vld [vmem:[#allocation2 + $0x79] sm:$0xff] }
 0x1df   : > { %v4500_v21 = vadd.f32 %v1974_v50, %v1770_v37  ;;  %v2258_v37 = vpack.c.b16 %v2212_v18, %v2211_v5  ;;  %v2154_v45 = vpack.c.bf16 %v2130_v47, %v2130_v47  ;;  %v1152_v25 = vunpack.c.l.b16 %v1068_v6  ;;  %v3804_v47 = vld [vmem:[%s4939_s9 + $0x38] sm:$0xff] }
 0x1e0   : > { %2041 = vmatmul.bf16.gmra.mxu3 %v1164_v13  ;;  %2094 = vmatmul.bf16.gmra.mxu1 %v4435_v35  ;;  %v2215_v13 = vunpack.c.l.b16 %v2155_v11  ;;  %v1071_v11 = vld [vmem:[#allocation2 + $0xdf] sm:$0xff] }
 0x1e1   : > { %2517 = vmatmul.bf16.gmra.mxu2 %v4498_v55  ;;  %v2214_v1 = vunpack.c.l.b16 %v2154_v45  ;;  %v1165_v31 = vpack.c.b16 %v1152_v25, %v4444_v52  ;;  %v1069_v52 = vpack.c.bf16 %v1066_v48, %v1066_v48  ;;  %2810 = vmatpush.bf16.msrb.mxu1 %v3804_v47 }
 0x1e3   : > { %v2008_v58 = vpop.f32.mrf.mxu3  ;;  %v4517_v2 = vpack.c.b16 %v2215_v13, %v2214_v1  ;;  %v2259_v3 = vpack.c.b16 %v2214_v1, %v2213_v63  ;;  %v1153_v18 = vunpack.c.l.b16 %v1069_v52 }
 0x1e4   : > { %v1781_v40 = vpop.f32.mrf.mxu2 }
 0x1e5   : > { %v1726_v16 = vpop.f32.mrf.mxu1 }
 0x1e6   : > { %v1977_v23 = vpop.f32.mrf.mxu0  ;;  %v1185_v16 = vpack.c.b16 %v1153_v18, %v1152_v25  ;;  %v2134_v25 = vld [vmem:[#allocation2 + $0x99] sm:$0xff] }
 0x1e7   : > { %v4507_v17 = vadd.f32 %v1977_v23, %v1773_v61  ;;  %v2158_v1 = vpack.c.bf16 %v2134_v25, %v2134_v25 }
 0x1e9   : > { %2570 = vmatmul.bf16.gmra.mxu0 %v2258_v37 }
 0x1eb   : > { %v2009_v8 = vpop.f32.mrf.mxu3 }
 0x1ec   : > { %v1782_v35 = vpop.f32.mrf.mxu2  ;;  %v4510_v54 = vadd.f32 %v2009_v8, %v4420_v15  ;;  %v1067_v15 = vld [vmem:[#allocation2 + $0xd7] sm:$0xff]  ;;  %v2135_v8 = vld [vmem:[#allocation2 + $0xa1] sm:$0xff] }
 0x1ed   : > { %v4512_v59 = vadd.f32 %v1782_v35, %v1722_v7  ;;  %v2064_v46 = vpop.f32.mrf.mxu1  ;;  %v2133_v7 = vld [vmem:[#allocation2 + $0x91] sm:$0xff]  ;;  %v1070_v30 = vpack.c.bf16 %v1067_v15, %v1067_v15  ;;  %v2218_v15 = vunpack.c.l.b16 %v2158_v1 }
 0x1ee   : > { %v4514_v4 = vadd.f32 %v2064_v46, %v2004_v62  ;;  %v1979_v61 = vpop.f32.mrf.mxu0  ;;  %v2157_v12 = vpack.c.bf16 %v2133_v7, %v2133_v7 }
 0x1ef   : > { %v1154_v36 = vunpack.c.l.b16 %v1070_v30 }
 0x1f0   : > { %2046 = vmatmul.bf16.gmra.mxu3 %v1165_v31  ;;  %2098 = vmatmul.bf16.gmra.mxu1 %v4451_v43  ;;  %v2217_v50 = vunpack.c.l.b16 %v2157_v12  ;;  %v2159_v31 = vpack.c.bf16 %v2135_v8, %v2135_v8 }
 0x1f1   : > { %2522 = vmatmul.bf16.gmra.mxu2 %v4517_v2  ;;  %v1166_v57 = vpack.c.b16 %v1154_v36, %v1153_v18 }
 0x1f3   : > { %v2012_v5 = vpop.f32.mrf.mxu3 }
 0x1f4   : > { %v1785_v27 = vpop.f32.mrf.mxu2  ;;  %v2013_v10 = vadd.f32 %v2012_v5, %v4431_v28  ;;  %v2915_v28 = vld [vmem:[%s4942_s12] sm:$0xf] }
 0x1f5   : > { %v4522_v62 = vadd.f32 %v1785_v27, %v1725_v39  ;;  %v4524_v9 = vpop.f32.mrf.mxu1  ;;  %v2216_v39 = vunpack.c.l.b16 %v2156_v0  ;;  %v2981_v58 = vsel %vm794_vm0, %v2915_v28, 0  ;;  %v2219_v27 = vunpack.c.l.b16 %v2159_v31  ;;  %v2137_v28 = vld [vmem:[#allocation2 + $0xb1] sm:$0xff] }
 0x1f6   : > { %v1981_v38 = vpop.f32.mrf.mxu0  ;;  %2990 = vmatpush.bf16.msrb.mxu2 %v2981_v58 }
 0x1f7   : > { %v4527_v43 = vadd.f32 %v1981_v38, %v4491_v51  ;;  %v4533_v6 = vpack.c.b16 %v2217_v50, %v2216_v39  ;;  %v2260_v61 = vpack.c.b16 %v2216_v39, %v2215_v13  ;;  %v4554_v0 = vpack.c.b16 %v2219_v27, %v2218_v15 }
 0x1f9   : > { %2574 = vmatmul.bf16.gmra.mxu0 %v2259_v3  ;;  %v1073_v3 = vld [vmem:[#allocation2 + $0xef] sm:$0xff] }
 0x1fa   : > { %v1076_v39 = vpack.c.bf16 %v1073_v3, %v1073_v3 }
 0x1fb   : > { %v2014_v19 = vpop.f32.mrf.mxu3 }
 0x1fc   : > { %v1787_v56 = vpop.f32.mrf.mxu2 }
 0x1fd   : > { %v2069_v40 = vpop.f32.mrf.mxu1  ;;  %v2161_v56 = vpack.c.bf16 %v2137_v28, %v2137_v28 }
 0x1fe   : > { %v1983_v51 = vpop.f32.mrf.mxu0 }
 0x1ff   : > { %v4536_v63 = vadd.f32 %v1983_v51, %v4496_v26  ;;  %v1074_v26 = vpack.c.bf16 %v1071_v11, %v1071_v11  ;;  %v3803_v51 = vld [vmem:[%s4939_s9 + $0x30] sm:$0xff] }
 0x200   : > { %2050 = vmatmul.bf16.gmra.mxu3 %v1166_v57  ;;  %2102 = vmatmul.bf16.gmra.mxu1 %v1185_v16  ;;  %v1184_v16 = vunpack.c.l.b16 %v1076_v39 }
 0x201   : > { %2526 = vmatmul.bf16.gmra.mxu2 %v4533_v6  ;;  %v1182_v5 = vunpack.c.l.b16 %v1074_v26  ;;  %2811 = vmatpush.bf16.msrb.mxu1 %v3803_v51 }
 0x203   : > { %v2016_v23 = vpop.f32.mrf.mxu3  ;;  %v1186_v30 = vpack.c.b16 %v1182_v5, %v1154_v36  ;;  %v2136_v36 = vld [vmem:[#allocation2 + $0xa9] sm:$0xff]  ;;  %v2138_v5 = vld [vmem:[#allocation2 + $0xb9] sm:$0xff] }
 0x204   : > { %v2017_v37 = vadd.f32 %v2016_v23, %v4447_v42  ;;  %v4543_v45 = vpop.f32.mrf.mxu2  ;;  %v2160_v57 = vpack.c.bf16 %v2136_v36, %v2136_v36  ;;  %v2221_v23 = vunpack.c.l.b16 %v2161_v56 }
 0x205   : > { %v4545_v35 = vpop.f32.mrf.mxu1 }
 0x206   : > { %v1986_v46 = vpop.f32.mrf.mxu0 }
 0x209   : > { %2578 = vmatmul.bf16.gmra.mxu0 %v2260_v61 }
 0x20b   : > { %v2018_v48 = vpop.f32.mrf.mxu3 }
 0x20c   : > { %v4548_v32 = vadd.f32 %v2018_v48, %v4455_v41  ;;  %v4550_v42 = vpop.f32.mrf.mxu2  ;;  %v1072_v41 = vld [vmem:[#allocation2 + $0xe7] sm:$0xff] }
 0x20d   : > { %v2073_v7 = vpop.f32.mrf.mxu1  ;;  %v2139_v48 = vld [vmem:[#allocation2 + $0xc1] sm:$0xff] }
 0x20e   : > { %v4552_v52 = vadd.f32 %v2073_v7, %v2013_v10  ;;  %v1987_v38 = vpop.f32.mrf.mxu0  ;;  %v1075_v10 = vpack.c.bf16 %v1072_v41, %v1072_v41 }
 0x20f   : > { %v4557_v12 = vadd.f32 %v1987_v38, %v4512_v59  ;;  %v2261_v59 = vpack.c.b16 %v2218_v15, %v2217_v50 }
 0x210   : > { %2107 = vmatmul.bf16.gmra.mxu1 %v1186_v30  ;;  %2613 = vmatmul.bf16.vlgmr.msra.gmra.mxu3 %v4461_v14  ;;  %v1183_v14 = vunpack.c.l.b16 %v1075_v10  ;;  %v2163_v30 = vpack.c.bf16 %v2139_v48, %v2139_v48  ;;  %v3802_v10 = vld [vmem:[%s4939_s9 + $0x28] sm:$0xff] }
 0x211   : > { %2530 = vmatmul.bf16.gmra.mxu2 %v4554_v0  ;;  %2812 = vmatpush.bf16.msrb.mxu1 %v3802_v10 }
 0x212   : > { %v1187_v50 = vpack.c.b16 %v1184_v16, %v1183_v14  ;;  %v2223_v3 = vunpack.c.l.b16 %v2163_v30 }
 0x213   : > { %v2021_v13 = vpop.f32.mrf.mxu3 }
 0x214   : > { %v2497_v18 = vpop.f32.mrf.mxu2 }
 0x215   : > { %v2075_v19 = vpop.f32.mrf.mxu1 }
 0x216   : > { %v1990_v58 = vpop.f32.mrf.mxu0 }
 0x217   : > { %v4562_v40 = vadd.f32 %v1990_v58, %v4522_v62  ;;  %v2220_v62 = vunpack.c.l.b16 %v2160_v57 }
 0x219   : > { %2583 = vmatmul.bf16.gmra.mxu0 %v2261_v59  ;;  %v4574_v1 = vpack.c.b16 %v2221_v23, %v2220_v62  ;;  %v2262_v13 = vpack.c.b16 %v2220_v62, %v2219_v27 }
 0x21b   : > { %v2022_v47 = vpop.f32.mrf.mxu3 }
 0x21c   : > { %v4568_v11 = vadd.f32 %v2022_v47, %v4463_v60  ;;  %v4570_v25 = vpop.f32.mrf.mxu2 }
 0x21d   : > { %v2077_v8 = vpop.f32.mrf.mxu1 }
 0x21e   : > { %v4572_v26 = vadd.f32 %v2077_v8, %v2017_v37  ;;  %v1992_v46 = vpop.f32.mrf.mxu0  ;;  %v2162_v37 = vpack.c.bf16 %v2138_v5, %v2138_v5  ;;  %v2166_v5 = vld [vmem:[#allocation2 + $0xd9] sm:$0xff] }
 0x220   : > { %2111 = vmatmul.bf16.gmra.mxu1 %v1187_v50  ;;  %2618 = vmatmul.bf16.gmra.mxu3 %v4472_v29  ;;  %v2222_v29 = vunpack.c.l.b16 %v2162_v37  ;;  %v2169_v37 = vpack.c.bf16 %v2166_v5, %v2166_v5 }
 0x221   : > { %2535 = vmatmul.bf16.gmra.mxu2 %v4574_v1 }
 0x222   : > { %v2263_v56 = vpack.c.b16 %v2222_v29, %v2221_v23  ;;  %v3801_v23 = vld [vmem:[%s4939_s9 + $0x20] sm:$0xff] }
 0x223   : > { %v2025_v31 = vpop.f32.mrf.mxu3  ;;  %2813 = vmatpush.bf16.msrb.mxu1 %v3801_v23 }
 0x224   : > { %v2026_v60 = vadd.f32 %v2025_v31, %v4470_v33  ;;  %v2501_v61 = vpop.f32.mrf.mxu2  ;;  %v4586_v33 = vpack.c.b16 %v2223_v3, %v2222_v29 }
 0x225   : > { %v4579_v15 = vpop.f32.mrf.mxu1 }
 0x226   : > { %v2553_v7 = vpop.f32.mrf.mxu0 }
 0x227   : > { %v4582_v38 = vadd.f32 %v2553_v7, %v4543_v45 }
 0x229   : > { %2587 = vmatmul.bf16.gmra.mxu0 %v2262_v13 }
 0x22b   : > { %v2027_v41 = vpop.f32.mrf.mxu3 }
 0x22c   : > { %v2503_v18 = vpop.f32.mrf.mxu2  ;;  %v4621_v41 = vunpack.c.l.b16 %v2169_v37  ;;  %v3799_v37 = vld [vmem:[%s4939_s9 + $0x10] sm:$0xff] }
 0x22d   : > { %v2082_v28 = vpop.f32.mrf.mxu1 }
 0x22e   : > { %v4584_v19 = vpop.f32.mrf.mxu0  ;;  %v2265_v18 = vpack.c.b16 %v4621_v41, %v4428_v24 }
 0x230   : > { %2622 = vmatmul.bf16.gmra.mxu3 %v4481_v34 }
 0x231   : > { %2539 = vmatmul.bf16.gmra.mxu2 %v4586_v33 }
 0x233   : > { %v2029_v45 = vpop.f32.mrf.mxu3 }
 0x234   : > { %v2030_v27 = vadd.f32 %v2029_v45, %v4479_v49  ;;  %v2505_v39 = vpop.f32.mrf.mxu2 }
 0x235   : > { %v4594_v36 = vpop.f32.mrf.mxu1 }
 0x236   : > { %v2558_v58 = vpop.f32.mrf.mxu0 }
 0x239   : > { %2591 = vmatmul.bf16.gmra.mxu0 %v2263_v56 }
 0x23b   : > { %v2031_v59 = vpop.f32.mrf.mxu3 }
 0x23c   : > { %v4597_v57 = vadd.f32 %v2031_v59, %v4483_v20  ;;  %v4599_v34 = vpop.f32.mrf.mxu2  ;;  %v2264_v20 = vpack.c.b16 %v4426_v22, %v2223_v3 }
 0x23d   : > { %v2086_v14 = vpop.f32.mrf.mxu1 }
 0x23e   : > { %v4601_v16 = vadd.f32 %v2086_v14, %v2026_v60  ;;  %v4603_v51 = vpop.f32.mrf.mxu0 }
 0x240   : > { %2626 = vmatmul.bf16.gmra.mxu3 %v4498_v55 }
 0x243   : > { %v2034_v49 = vpop.f32.mrf.mxu3 }
 0x244   : > { %v2510_v47 = vpop.f32.mrf.mxu2 }
 0x245   : > { %v2088_v8 = vpop.f32.mrf.mxu1 }
 0x246   : > { %v2562_v62 = vpop.f32.mrf.mxu0 }
 0x247   : > { %v4609_v50 = vadd.f32 %v2562_v62, %v2501_v61 }
 0x249   : > { %2596 = vmatmul.bf16.gmra.mxu0 %v2264_v20 }
 0x24b   : > { %v2035_v46 = vpop.f32.mrf.mxu3 }
 0x24c   : > { %v4613_v31 = vadd.f32 %v2035_v46, %v4500_v21  ;;  %v4615_v60 = vpop.f32.mrf.mxu2 }
 0x24d   : > { %v2090_v55 = vpop.f32.mrf.mxu1 }
 0x24e   : > { %v4617_v48 = vadd.f32 %v2090_v55, %v2030_v27  ;;  %v2564_v7 = vpop.f32.mrf.mxu0 }
 0x250   : > { %2631 = vmatmul.bf16.gmra.mxu3 %v4517_v2 }
 0x253   : > { %v2038_v61 = vpop.f32.mrf.mxu3 }
 0x254   : > { %v2039_v30 = vadd.f32 %v2038_v61, %v4507_v17  ;;  %v2514_v13 = vpop.f32.mrf.mxu2  ;;  %v3800_v17 = vld [vmem:[%s4939_s9 + $0x18] sm:$0xff] }
 0x255   : > { %v4623_v29 = vpop.f32.mrf.mxu1  ;;  %2814 = vmatpush.bf16.msrb.mxu1 %v3800_v17 }
 0x256   : > { %v2566_v21 = vpop.f32.mrf.mxu0 }
 0x257   : > { %v4625_v3 = vadd.f32 %v2566_v21, %v2505_v39 }
 0x259   : > { %2600 = vmatmul.bf16.gmra.mxu0 %v2265_v18  ;;  %2815 = vmatpush.bf16.msrb.mxu1 %v3799_v37  ;;  %v3806_v37 = vld [vmem:[%s4118_s25 + $0x8] sm:$0xff] }
 0x25b   : > { %v2040_v28 = vpop.f32.mrf.mxu3 }
 0x25c   : > { %v2516_v10 = vpop.f32.mrf.mxu2  ;;  %v3805_v28 = vld [vmem:[%s4118_s25] sm:$0xff] }
 0x25d   : > { %v2095_v45 = vpop.f32.mrf.mxu1  ;;  %3705 = vmatmul.msk.bf16.vlgmr.msrb.gmra.mxu2 %vm769_vm1, %v3805_v28 }
 0x25e   : > { %v4629_v2 = vpop.f32.mrf.mxu0 }
 0x260   : > { %2635 = vmatmul.bf16.gmra.mxu3 %v4533_v6 }
 0x263   : > { %v2042_v27 = vpop.f32.mrf.mxu3 }
 0x264   : > { %v2043_v39 = vadd.f32 %v2042_v27, %v4527_v43  ;;  %v2518_v58 = vpop.f32.mrf.mxu2 }
 0x265   : > { %v4636_v56 = vpop.f32.mrf.mxu1 }
 0x266   : > { %v2571_v59 = vpop.f32.mrf.mxu0 }
 0x26b   : > { %v2044_v14 = vpop.f32.mrf.mxu3 }
 0x26c   : > { %v2045_v49 = vadd.f32 %v2044_v14, %v4536_v63  ;;  %v4639_v47 = vpop.f32.mrf.mxu2 }
 0x26d   : > { %v2099_v8 = vpop.f32.mrf.mxu1  ;;  %3706 = vmatmul.msk.bf16.gmra.mxu2 %vm769_vm1, %v3806_v37 }
 0x26e   : > { %v4641_v62 = vadd.f32 %v2099_v8, %v2039_v30  ;;  %v4643_v6 = vpop.f32.mrf.mxu0 }
 0x270   : > { %2639 = vmatmul.bf16.gmra.mxu3 %v4554_v0 }
 0x273   : > { %v2047_v23 = vpop.f32.mrf.mxu3 }
 0x274   : > { %v2523_v20 = vpop.f32.mrf.mxu2 }
 0x275   : > { %v2101_v46 = vpop.f32.mrf.mxu1 }
 0x276   : > { %v2575_v43 = vpop.f32.mrf.mxu0 }
 0x277   : > { %v4646_v55 = vadd.f32 %v2575_v43, %v2514_v13  ;;  %v3798_v13 = vld [vmem:[%s4939_s9 + $0x8] sm:$0xff] }
 0x278   : > { %2816 = vmatpush.bf16.msrb.mxu1 %v3798_v13 }
 0x27b   : > { %v2048_v5 = vpop.f32.mrf.mxu3 }
 0x27c   : > { %v2049_v7 = vadd.f32 %v2048_v5, %v4557_v12  ;;  %v4649_v63 = vpop.f32.mrf.mxu2 }
 0x27d   : > { %v2103_v61 = vpop.f32.mrf.mxu1 }
 0x27e   : > { %v4654_v30 = vadd.f32 %v2103_v61, %v2043_v39  ;;  %v2577_v0 = vpop.f32.mrf.mxu0  ;;  %v2556_v61 = vadd.f32 %v4584_v19, %v4550_v42 }
 0x280   : > { %2644 = vmatmul.bf16.gmra.mxu3 %v4574_v1  ;;  %v3797_v1 = vld [vmem:[%s4939_s9] sm:$0xff] }
 0x281   : > { %2817 = vmatpush.bf16.msrb.mxu1 %v3797_v1  ;;  %v2170_v1 = vld [vmem:[#allocation2 + $0xe1] sm:$0xff] }
 0x283   : > { %v2051_v21 = vpop.f32.mrf.mxu3 }
 0x284   : > { %v2052_v12 = vadd.f32 %v2051_v21, %v4562_v40  ;;  %v2527_v18 = vpop.f32.mrf.mxu2 }
 0x285   : > { %v2105_v10 = vpop.f32.mrf.mxu1 }
 0x286   : > { %v4662_v45 = vadd.f32 %v2105_v10, %v2045_v49  ;;  %v2579_v17 = vpop.f32.mrf.mxu0 }
 0x287   : > { %v4668_v27 = vadd.f32 %v2579_v17, %v2518_v58  ;;  %v4680_v58 = vld [vmem:[%s4937_s7] ss:$0 sm:$0xff] }
 0x28b   : > { %v2053_v39 = vpop.f32.mrf.mxu3 }
 0x28c   : > { %v2529_v59 = vpop.f32.mrf.mxu2 }
 0x28d   : > { %v2108_v40 = vpop.f32.mrf.mxu1 }
 0x28e   : > { %v4670_v14 = vpop.f32.mrf.mxu0 }
 0x290   : > { %2648 = vmatmul.bf16.gmra.mxu3 %v4586_v33 }
 0x293   : > { %v2614_v49 = vpop.f32.mrf.mxu3 }
 0x294   : > { %v2531_v8 = vpop.f32.mrf.mxu2  ;;  %v2615_v23 = vadd.f32 %v2614_v49, %v4582_v38  ;;  %v2067_v38 = vadd.f32 %v4524_v9, %v4494_v44 }
 0x295   : > { %v2109_v20 = vpop.f32.mrf.mxu1 }
 0x296   : > { %v2666_v46 = vadd.f32 %v2615_v23, %v4514_v4  ;;  %v4675_v43 = vadd.f32 %v2109_v20, %v2049_v7  ;;  %v2584_v5 = vpop.f32.mrf.mxu0  ;;  %v4692_v7 = vld [vmem:[%s4938_s8] ss:$0 sm:$0xff]  ;;  %v2173_v23 = vpack.c.bf16 %v2170_v1, %v2170_v1 }
 0x297   : > { %v2560_v5 = vadd.f32 %v4603_v51, %v4570_v25 }
 0x298   : > { %v2686_v4 = vmul.f32 %v4680_v58, %v2666_v46  ;;  %v2281_v22 = vunpack.c.l.b16 %v2173_v23 }
 0x29a   : > { %v2706_v19 = vadd.f32 %v4692_v7, %v2686_v4 }
 0x29b   : > { %v2616_v33 = vpop.f32.mrf.mxu3 }
 0x29c   : > { %v2533_v0 = vpop.f32.mrf.mxu2  ;;  %v2617_v21 = vadd.f32 %v2616_v33, %v2556_v61  ;;  %v2722_v39 = vmax.f32 %v2706_v19, 0.0 }
 0x29d   : > { %v2112_v13 = vpop.f32.mrf.mxu1 }
 0x29e   : > { %v2667_v28 = vadd.f32 %v2617_v21, %v2067_v38  ;;  %v4694_v10 = vadd.f32 %v2112_v13, %v2052_v12  ;;  %v4696_v42 = vpop.f32.mrf.mxu0  ;;  %v2285_v38 = vpack.c.b16 %v2281_v22, %v4621_v41  ;;  %v3807_v21 = vld [vmem:[%s4118_s25 + $0x10] sm:$0xff] }
 0x29f   : > { %3707 = vmatmul.msk.bf16.gmra.mxu2 %vm769_vm1, %v3807_v21  ;;  %v2171_v13 = vld [vmem:[#allocation2 + $0xe9] sm:$0xff]  ;;  %v2080_v21 = vadd.f32 %v4579_v15, %v4548_v32  ;;  %v2573_v15 = vadd.f32 %v4643_v6, %v4615_v60 }
 0x2a0   : > { %v2687_v17 = vmul.f32 %v4680_v58, %v2667_v28  ;;  %2652 = vmatmul.bf16.gmra.mxu3 %v2284_v53  ;;  %v2071_v53 = vadd.f32 %v4545_v35, %v4510_v54  ;;  %v2172_v28 = vld [vmem:[#allocation2 + $0xf1] sm:$0xff]  ;;  %v2174_v35 = vpack.c.bf16 %v2171_v13, %v2171_v13 }
 0x2a2   : > { %v2707_v44 = vadd.f32 %v4692_v7, %v2687_v17  ;;  %v2175_v17 = vpack.c.bf16 %v2172_v28, %v2172_v28 }
 0x2a3   : > { %v2619_v9 = vpop.f32.mrf.mxu3 }
 0x2a4   : > { %v2723_v59 = vmax.f32 %v2707_v44, 0.0  ;;  %v2536_v40 = vpop.f32.mrf.mxu2 }
 0x2a5   : > { %v2114_v49 = vpop.f32.mrf.mxu1 }
 0x2a6   : > { %v2738_v12 = vpack.c.bf16 %v2723_v59, %v2722_v39  ;;  %v2588_v20 = vpop.f32.mrf.mxu0  ;;  %v2282_v39 = vunpack.c.l.b16 %v2174_v35  ;;  %v2283_v59 = vunpack.c.l.b16 %v2175_v17 }
 0x2a7   : > { %v4704_v46 = vadd.f32 %v2588_v20, %v2527_v18 }
 0x2a8   : > { %2818 = vmatmul.bf16.vlgmr.msrb.gmra.mxu1 %v2738_v12  ;;  %v2286_v20 = vpack.c.b16 %v2283_v59, %v2282_v39  ;;  %v3809_v59 = vld [vmem:[%s4118_s25 + $0x20] sm:$0xff] }
 0x2ab   : > { %v2620_v24 = vpop.f32.mrf.mxu3 }
 0x2ac   : > { %v2537_v37 = vpop.f32.mrf.mxu2  ;;  %v2621_v61 = vadd.f32 %v2620_v24, %v2560_v5 }
 0x2ae   : > { %v2668_v33 = vadd.f32 %v2621_v61, %v2071_v53  ;;  %v2590_v4 = vpop.f32.mrf.mxu0 }
 0x2b0   : > { %2657 = vmatmul.bf16.gmra.mxu3 %v2285_v38  ;;  %v2688_v25 = vmul.f32 %v4680_v58, %v2668_v33  ;;  %v3808_v33 = vld [vmem:[%s4118_s25 + $0x18] sm:$0xff]  ;;  %v2569_v38 = vadd.f32 %v4629_v2, %v4599_v34 }
 0x2b1   : > { %3708 = vmatmul.msk.bf16.gmra.mxu2 %vm769_vm1, %v3808_v33 }
 0x2b2   : > { %v2708_v1 = vadd.f32 %v4692_v7, %v2688_v25 }
 0x2b3   : > { %v2623_v18 = vpop.f32.mrf.mxu3 }
 0x2b4   : > { %v2540_v51 = vpop.f32.mrf.mxu2  ;;  %v2624_v19 = vadd.f32 %v2623_v18, %v4609_v50  ;;  %v2724_v23 = vmax.f32 %v2708_v1, 0.0 }
 0x2b6   : > { %v2669_v54 = vadd.f32 %v2624_v19, %v4552_v52  ;;  %v2592_v44 = vpop.f32.mrf.mxu0 }
 0x2b7   : > { %v4717_v9 = vadd.f32 %v2592_v44, %v2531_v8 }
 0x2b8   : > { %v2689_v41 = vmul.f32 %v4680_v58, %v2669_v54 }
 0x2ba   : > { %v2709_v40 = vadd.f32 %v4692_v7, %v2689_v41 }
 0x2bb   : > { %v2625_v49 = vpop.f32.mrf.mxu3 }
 0x2bc   : > { %v2542_v12 = vpop.f32.mrf.mxu2  ;;  %v2725_v50 = vmax.f32 %v2709_v40, 0.0 }
 0x2be   : > { %v2739_v52 = vpack.c.bf16 %v2725_v50, %v2724_v23  ;;  %v2594_v5 = vpop.f32.mrf.mxu0 }
 0x2bf   : > { %v4721_v22 = vadd.f32 %v2594_v5, %v2533_v0 }
 0x2c0   : > { %2661 = vmatmul.bf16.gmra.mxu3 %v2286_v20  ;;  %2823 = vmatmul.bf16.gmra.mxu1 %v2739_v52 }
 0x2c1   : > { %3709 = vmatmul.msk.bf16.gmra.mxu2 %vm769_vm1, %v3809_v59  ;;  %v3812_v59 = vld [vmem:[%s4118_s25 + $0x38] sm:$0xff] }
 0x2c3   : > { %v2627_v8 = vpop.f32.mrf.mxu3 }
 0x2c4   : > { %v2628_v24 = vadd.f32 %v2627_v8, %v4625_v3 }
 0x2c6   : > { %v2670_v53 = vadd.f32 %v2628_v24, %v4572_v26  ;;  %v2597_v61 = vpop.f32.mrf.mxu0  ;;  %v3810_v24 = vld [vmem:[%s4118_s25 + $0x28] sm:$0xff] }
 0x2c8   : > { %v2690_v0 = vmul.f32 %v4680_v58, %v2670_v53  ;;  %v2093_v53 = vadd.f32 %v4623_v29, %v4597_v57  ;;  %v2097_v29 = vadd.f32 %v4636_v56, %v4613_v31 }
 0x2ca   : > { %v2710_v26 = vadd.f32 %v4692_v7, %v2690_v0 }
 0x2cb   : > { %v2629_v4 = vpop.f32.mrf.mxu3 }
 0x2cc   : > { %v2630_v18 = vadd.f32 %v2629_v4, %v2569_v38  ;;  %v2726_v19 = vmax.f32 %v2710_v26, 0.0 }
 0x2ce   : > { %v2671_v13 = vadd.f32 %v2630_v18, %v2080_v21  ;;  %v2598_v28 = vpop.f32.mrf.mxu0  ;;  %v2586_v18 = vadd.f32 %v4696_v42, %v4649_v63 }
 0x2cf   : > { %v4733_v25 = vadd.f32 %v2598_v28, %v2537_v37  ;;  %v2084_v37 = vadd.f32 %v4594_v36, %v4568_v11 }
 0x2d0   : > { %v2691_v3 = vmul.f32 %v4680_v58, %v2671_v13 }
 0x2d1   : > { %3710 = vmatmul.msk.bf16.gmra.mxu2 %vm769_vm1, %v3810_v24 }
 0x2d2   : > { %v2711_v34 = vadd.f32 %v4692_v7, %v2691_v3 }
 0x2d3   : > { %v2632_v2 = vpop.f32.mrf.mxu3 }
 0x2d4   : > { %v2727_v54 = vmax.f32 %v2711_v34, 0.0  ;;  %v3811_v2 = vld [vmem:[%s4118_s25 + $0x30] sm:$0xff] }
 0x2d6   : > { %v2740_v35 = vpack.c.bf16 %v2727_v54, %v2726_v19  ;;  %v2601_v17 = vpop.f32.mrf.mxu0 }
 0x2d7   : > { %v4737_v32 = vadd.f32 %v2601_v17, %v2540_v51 }
 0x2d8   : > { %2828 = vmatmul.bf16.gmra.mxu1 %v2740_v35 }
 0x2db   : > { %v2633_v44 = vpop.f32.mrf.mxu3 }
 0x2dc   : > { %v2634_v41 = vadd.f32 %v2633_v44, %v2573_v15 }
 0x2de   : > { %v2672_v1 = vadd.f32 %v2634_v41, %v2084_v37  ;;  %v2603_v39 = vpop.f32.mrf.mxu0  ;;  %v4789_v37 = vld [vmem:[%s4944_s14] ss:$0 sm:$0xff] }
 0x2df   : > { %v4795_v39 = vld [vmem:[%s4941_s11] ss:$0 sm:$0xff] }
 0x2e0   : > { %v2692_v49 = vmul.f32 %v4680_v58, %v2672_v1  ;;  %v2992_v17 = vpop.f32.mrf.mxu2 }
 0x2e1   : > { %3711 = vmatmul.msk.bf16.gmra.mxu2 %vm769_vm1, %v3811_v2 }
 0x2e2   : > { %v2712_v6 = vadd.f32 %v4692_v7, %v2692_v49 }
 0x2e3   : > { %v2636_v40 = vpop.f32.mrf.mxu3 }
 0x2e4   : > { %v2637_v51 = vadd.f32 %v2636_v40, %v4646_v55  ;;  %v2728_v23 = vmax.f32 %v2712_v6, 0.0 }
 0x2e6   : > { %v2673_v12 = vadd.f32 %v2637_v51, %v4601_v16  ;;  %v2582_v16 = vadd.f32 %v4670_v14, %v4639_v47 }
 0x2e8   : > { %v2693_v60 = vmul.f32 %v4680_v58, %v2673_v12 }
 0x2ea   : > { %v2713_v11 = vadd.f32 %v4692_v7, %v2693_v60  ;;  %v2994_v60 = vpop.f32.mrf.mxu2 }
 0x2eb   : > { %v2638_v36 = vpop.f32.mrf.mxu3 }
 0x2ec   : > { %v2729_v50 = vmax.f32 %v2713_v11, 0.0 }
 0x2ee   : > { %v2741_v20 = vpack.c.bf16 %v2729_v50, %v2728_v23 }
 0x2f0   : > { %2833 = vmatmul.bf16.gmra.mxu1 %v2741_v20 }
 0x2f1   : > { %3712 = vmatmul.msk.bf16.gmra.mxu2 %vm769_vm1, %v3812_v59 }
 0x2f3   : > { %v2640_v52 = vpop.f32.mrf.mxu3 }
 0x2f4   : > { %v2641_v5 = vadd.f32 %v2640_v52, %v4668_v27 }
 0x2f6   : > { %v2674_v8 = vadd.f32 %v2641_v5, %v4617_v48 }
 0x2f8   : > { %v2694_v61 = vmul.f32 %v4680_v58, %v2674_v8 }
 0x2fa   : > { %v2714_v27 = vadd.f32 %v4692_v7, %v2694_v61 }
 0x2fb   : > { %v2642_v55 = vpop.f32.mrf.mxu3 }
 0x2fc   : > { %v2643_v33 = vadd.f32 %v2642_v55, %v2582_v16  ;;  %v2730_v0 = vmax.f32 %v2714_v27, 0.0  ;;  %v2997_v27 = vpop.f32.mrf.mxu2 }
 0x2fe   : > { %v2675_v38 = vadd.f32 %v2643_v33, %v2093_v53 }
 0x300   : > { %v2695_v4 = vmul.f32 %v4680_v58, %v2675_v38 }
 0x302   : > { %v2715_v48 = vadd.f32 %v4692_v7, %v2695_v4 }
 0x303   : > { %v2645_v21 = vpop.f32.mrf.mxu3 }
 0x304   : > { %v2731_v47 = vmax.f32 %v2715_v48, 0.0 }
 0x306   : > { %v2742_v14 = vpack.c.bf16 %v2731_v47, %v2730_v0 }
 0x308   : > { %2838 = vmatmul.bf16.gmra.mxu1 %v2742_v14 }
 0x30b   : > { %v2646_v57 = vpop.f32.mrf.mxu3 }
 0x30c   : > { %v2647_v13 = vadd.f32 %v2646_v57, %v2586_v18 }
 0x30e   : > { %v2676_v28 = vadd.f32 %v2647_v13, %v2097_v29 }
 0x310   : > { %v2696_v26 = vmul.f32 %v4680_v58, %v2676_v28  ;;  %v2999_v28 = vpop.f32.mrf.mxu2 }
 0x312   : > { %v2716_v63 = vadd.f32 %v4692_v7, %v2696_v26 }
 0x313   : > { %v2649_v3 = vpop.f32.mrf.mxu3 }
 0x314   : > { %v2650_v34 = vadd.f32 %v2649_v3, %v4704_v46  ;;  %v2732_v56 = vmax.f32 %v2716_v63, 0.0  ;;  %v4778_v46 = vld [vmem:[%s4943_s13] ss:$0 sm:$0xff] }
 0x315   : > { %v3036_v44 = vmul.f32 %v4778_v46, %v2992_v17  ;;  %v3037_v11 = vmul.f32 %v4778_v46, %v2994_v60  ;;  %v3038_v0 = vmul.f32 %v4778_v46, %v2997_v27 }
 0x316   : > { %v2677_v19 = vadd.f32 %v2650_v34, %v4641_v62  ;;  %v4783_v62 = vld [vmem:[%s4940_s10] ss:$0 sm:$0xff]  ;;  %v3039_v34 = vmul.f32 %v4778_v46, %v2999_v28 }
 0x317   : > { %v3056_v12 = vadd.f32 %v4789_v37, %v3036_v44  ;;  %v3057_v24 = vadd.f32 %v4789_v37, %v3037_v11  ;;  %v3058_v13 = vadd.f32 %v4789_v37, %v3038_v0 }
 0x318   : > { %v2697_v54 = vmul.f32 %v4680_v58, %v2677_v19 }
 0x31a   : > { %v2717_v42 = vadd.f32 %v4692_v7, %v2697_v54 }
 0x31b   : > { %v2651_v31 = vpop.f32.mrf.mxu3 }
 0x31c   : > { %v2733_v35 = vmax.f32 %v2717_v42, 0.0 }
 0x31e   : > { %v2743_v15 = vpack.c.bf16 %v2733_v35, %v2732_v56  ;;  %v3059_v56 = vadd.f32 %v4789_v37, %v3039_v34 }
 0x320   : > { %2843 = vmatmul.bf16.gmra.mxu1 %v2743_v15 }
 0x323   : > { %v2653_v41 = vpop.f32.mrf.mxu3 }
 0x324   : > { %v2654_v1 = vadd.f32 %v2653_v41, %v4717_v9 }
 0x325   : > { %v2819_v40 = vpop.f32.mrf.mxu1 }
 0x326   : > { %v2678_v49 = vadd.f32 %v2654_v1, %v4654_v30  ;;  %v2863_v51 = vmul.f32 %v4783_v62, %v2819_v40  ;;  %v3002_v40 = vpop.f32.mrf.mxu2 }
 0x328   : > { %v2883_v6 = vadd.f32 %v4795_v39, %v2863_v51  ;;  %v2698_v23 = vmul.f32 %v4680_v58, %v2678_v49 }
 0x32a   : > { %v3072_v9 = vadd.f32 %v3056_v12, %v2883_v6  ;;  %v2718_v55 = vadd.f32 %v4692_v7, %v2698_v23 }
 0x32b   : > { %v2655_v36 = vpop.f32.mrf.mxu3 }
 0x32c   : > { %v3088_v50 = vmax.f32 %v3072_v9, 0.0  ;;  %v2656_v20 = vadd.f32 %v2655_v36, %v4721_v22  ;;  %v2734_v4 = vmax.f32 %v2718_v55, 0.0 }
 0x32d   : > { %v2821_v30 = vpop.f32.mrf.mxu1 }
 0x32e   : > { %v3104_v52 = vpack.c.bf16 %v3088_v50, %v3088_v50  ;;  %v2679_v5 = vadd.f32 %v2656_v20, %v4662_v45  ;;  %v2864_v8 = vmul.f32 %v4783_v62, %v2821_v30 }
 0x330   : > { %3121 = vst.msk [vmem:[%s4810_s30] sm:$0xf] %vm3120_vm2, %v3104_v52  ;;  %v2699_v22 = vmul.f32 %v4680_v58, %v2679_v5  ;;  %v2884_v16 = vadd.f32 %v4795_v39, %v2864_v8 }
 0x332   : > { %v3073_v53 = vadd.f32 %v3057_v24, %v2884_v16  ;;  %v2719_v61 = vadd.f32 %v4692_v7, %v2699_v22 }
 0x333   : > { %v2658_v33 = vpop.f32.mrf.mxu3 }
 0x334   : > { %v3089_v38 = vmax.f32 %v3073_v53, 0.0  ;;  %v2735_v45 = vmax.f32 %v2719_v61, 0.0 }
 0x336   : > { %v3105_v48 = vpack.c.bf16 %v3089_v38, %v3089_v38  ;;  %v2744_v21 = vpack.c.bf16 %v2735_v45, %v2734_v4 }
 0x338   : > { %3122 = vst.msk [vmem:[%s4810_s30 + $0x4] sm:$0xf] %vm3120_vm2, %v3105_v48  ;;  %2848 = vmatmul.bf16.gmra.mxu1 %v2744_v21 }
 0x33b   : > { %v2659_v47 = vpop.f32.mrf.mxu3 }
 0x33c   : > { %v2660_v14 = vadd.f32 %v2659_v47, %v4733_v25 }
 0x33d   : > { %v2824_v18 = vpop.f32.mrf.mxu1 }
 0x33e   : > { %v2680_v57 = vadd.f32 %v2660_v14, %v4675_v43  ;;  %v2865_v29 = vmul.f32 %v4783_v62, %v2824_v18 }
 0x340   : > { %v2885_v3 = vadd.f32 %v4795_v39, %v2865_v29  ;;  %v2700_v19 = vmul.f32 %v4680_v58, %v2680_v57 }
 0x342   : > { %v3074_v26 = vadd.f32 %v3058_v13, %v2885_v3  ;;  %v2720_v15 = vadd.f32 %v4692_v7, %v2700_v19 }
 0x343   : > { %v2662_v2 = vpop.f32.mrf.mxu3 }
 0x344   : > { %v3090_v54 = vmax.f32 %v3074_v26, 0.0  ;;  %v2663_v25 = vadd.f32 %v2662_v2, %v4737_v32  ;;  %v2736_v59 = vmax.f32 %v2720_v15, 0.0 }
 0x345   : > { %v2826_v63 = vpop.f32.mrf.mxu1 }
 0x346   : > { %v3106_v42 = vpack.c.bf16 %v3090_v54, %v3090_v54  ;;  %v2681_v43 = vadd.f32 %v2663_v25, %v4694_v10  ;;  %v2866_v31 = vmul.f32 %v4783_v62, %v2826_v63 }
 0x348   : > { %3123 = vst.msk [vmem:[%s4810_s30 + $0x8] sm:$0xf] %vm3120_vm2, %v3106_v42  ;;  %v2701_v35 = vmul.f32 %v4680_v58, %v2681_v43  ;;  %v2886_v17 = vadd.f32 %v4795_v39, %v2866_v31  ;;  %v3040_v58 = vmul.f32 %v4778_v46, %v3002_v40 }
 0x34a   : > { %v3075_v44 = vadd.f32 %v3059_v56, %v2886_v17  ;;  %v2721_v32 = vadd.f32 %v4692_v7, %v2701_v35  ;;  %v3060_v6 = vadd.f32 %v4789_v37, %v3040_v58  ;;  %v3004_v7 = vpop.f32.mrf.mxu2 }
 0x34b   : > { %v2664_v41 = vpop.f32.mrf.mxu3  ;;  %v3041_v36 = vmul.f32 %v4778_v46, %v3004_v7 }
 0x34c   : > { %v3091_v1 = vmax.f32 %v3075_v44, 0.0  ;;  %v2737_v10 = vmax.f32 %v2721_v32, 0.0 }
 0x34d   : > { %v3061_v52 = vadd.f32 %v4789_v37, %v3041_v36 }
 0x34e   : > { %v3107_v49 = vpack.c.bf16 %v3091_v1, %v3091_v1  ;;  %v2745_v51 = vpack.c.bf16 %v2737_v10, %v2736_v59 }
 0x350   : > { %3124 = vst.msk [vmem:[%s4810_s30 + $0xc] sm:$0xf] %vm3120_vm2, %v3107_v49  ;;  %2853 = vmatmul.bf16.gmra.mxu1 %v2745_v51 }
 0x352   : > { %v3007_v22 = vpop.f32.mrf.mxu2 }
 0x353   : > { %v3042_v55 = vmul.f32 %v4778_v46, %v3007_v22 }
 0x355   : > { %v2829_v12 = vpop.f32.mrf.mxu1  ;;  %v3062_v33 = vadd.f32 %v4789_v37, %v3042_v55 }
 0x356   : > { %v2867_v60 = vmul.f32 %v4783_v62, %v2829_v12 }
 0x358   : > { %v2887_v9 = vadd.f32 %v4795_v39, %v2867_v60 }
 0x35a   : > { %v3076_v11 = vadd.f32 %v3060_v6, %v2887_v9  ;;  %v3009_v38 = vpop.f32.mrf.mxu2 }
 0x35b   : > { %v3043_v27 = vmul.f32 %v4778_v46, %v3009_v38 }
 0x35c   : > { %v3092_v23 = vmax.f32 %v3076_v11, 0.0 }
 0x35d   : > { %v2831_v50 = vpop.f32.mrf.mxu1  ;;  %v3063_v14 = vadd.f32 %v4789_v37, %v3043_v27 }
 0x35e   : > { %v3108_v20 = vpack.c.bf16 %v3092_v23, %v3092_v23  ;;  %v2868_v30 = vmul.f32 %v4783_v62, %v2831_v50 }
 0x360   : > { %3125 = vst.msk [vmem:[%s4810_s30 + $0x10] sm:$0xf] %vm3120_vm2, %v3108_v20  ;;  %v2888_v5 = vadd.f32 %v4795_v39, %v2868_v30 }
 0x362   : > { %v3077_v8 = vadd.f32 %v3061_v52, %v2888_v5  ;;  %v3012_v13 = vpop.f32.mrf.mxu2 }
 0x363   : > { %v3044_v3 = vmul.f32 %v4778_v46, %v3012_v13 }
 0x364   : > { %v3093_v24 = vmax.f32 %v3077_v8, 0.0 }
 0x365   : > { %v3064_v2 = vadd.f32 %v4789_v37, %v3044_v3 }
 0x366   : > { %v3109_v16 = vpack.c.bf16 %v3093_v24, %v3093_v24 }
 0x368   : > { %3126 = vst.msk [vmem:[%s4810_s30 + $0x14] sm:$0xf] %vm3120_vm2, %v3109_v16 }
 0x36a   : > { %v3014_v19 = vpop.f32.mrf.mxu2 }
 0x36b   : > { %v3045_v63 = vmul.f32 %v4778_v46, %v3014_v19 }
 0x36d   : > { %v2834_v53 = vpop.f32.mrf.mxu1  ;;  %v3065_v35 = vadd.f32 %v4789_v37, %v3045_v63 }
 0x36e   : > { %v2869_v61 = vmul.f32 %v4783_v62, %v2834_v53 }
 0x370   : > { %v2889_v4 = vadd.f32 %v4795_v39, %v2869_v61 }
 0x372   : > { %v3078_v45 = vadd.f32 %v3062_v33, %v2889_v4  ;;  %v3017_v32 = vpop.f32.mrf.mxu2 }
 0x373   : > { %v3046_v1 = vmul.f32 %v4778_v46, %v3017_v32 }
 0x374   : > { %v3094_v48 = vmax.f32 %v3078_v45, 0.0 }
 0x375   : > { %v2836_v21 = vpop.f32.mrf.mxu1  ;;  %v3066_v40 = vadd.f32 %v4789_v37, %v3046_v1 }
 0x376   : > { %v3110_v0 = vpack.c.bf16 %v3094_v48, %v3094_v48  ;;  %v2870_v47 = vmul.f32 %v4783_v62, %v2836_v21 }
 0x378   : > { %3127 = vst.msk [vmem:[%s4810_s30 + $0x18] sm:$0xf] %vm3120_vm2, %v3110_v0  ;;  %v2890_v18 = vadd.f32 %v4795_v39, %v2870_v47 }
 0x37a   : > { %v3079_v57 = vadd.f32 %v3063_v14, %v2890_v18  ;;  %v3019_v49 = vpop.f32.mrf.mxu2 }
 0x37b   : > { %v3047_v12 = vmul.f32 %v4778_v46, %v3019_v49 }
 0x37c   : > { %v3095_v29 = vmax.f32 %v3079_v57, 0.0 }
 0x37d   : > { %v3067_v11 = vadd.f32 %v4789_v37, %v3047_v12 }
 0x37e   : > { %v3111_v28 = vpack.c.bf16 %v3095_v29, %v3095_v29 }
 0x380   : > { %3128 = vst.msk [vmem:[%s4810_s30 + $0x1c] sm:$0xf] %vm3120_vm2, %v3111_v28 }
 0x382   : > { %v3022_v20 = vpop.f32.mrf.mxu2 }
 0x383   : > { %v3048_v52 = vmul.f32 %v4778_v46, %v3022_v20 }
 0x385   : > { %v2839_v26 = vpop.f32.mrf.mxu1  ;;  %v3068_v24 = vadd.f32 %v4789_v37, %v3048_v52 }
 0x386   : > { %v2871_v34 = vmul.f32 %v4783_v62, %v2839_v26 }
 0x388   : > { %v2891_v54 = vadd.f32 %v4795_v39, %v2871_v34 }
 0x38a   : > { %v3080_v25 = vadd.f32 %v3064_v2, %v2891_v54  ;;  %v3024_v22 = vpop.f32.mrf.mxu2 }
 0x38b   : > { %v3049_v53 = vmul.f32 %v4778_v46, %v3024_v22 }
 0x38c   : > { %v3096_v42 = vmax.f32 %v3080_v25, 0.0 }
 0x38d   : > { %v2841_v43 = vpop.f32.mrf.mxu1  ;;  %v3069_v45 = vadd.f32 %v4789_v37, %v3049_v53 }
 0x38e   : > { %v3112_v31 = vpack.c.bf16 %v3096_v42, %v3096_v42  ;;  %v2872_v56 = vmul.f32 %v4783_v62, %v2841_v43 }
 0x390   : > { %3129 = vst.msk [vmem:[%s4810_s30 + $0x20] sm:$0xf] %vm3120_vm2, %v3112_v31  ;;  %v2892_v17 = vadd.f32 %v4795_v39, %v2872_v56 }
 0x392   : > { %v3081_v15 = vadd.f32 %v3065_v35, %v2892_v17  ;;  %v3027_v47 = vpop.f32.mrf.mxu2 }
 0x393   : > { %v3050_v14 = vmul.f32 %v4778_v46, %v3027_v47 }
 0x394   : > { %v3097_v44 = vmax.f32 %v3081_v15, 0.0 }
 0x395   : > { %v3070_v57 = vadd.f32 %v4789_v37, %v3050_v14 }
 0x396   : > { %v3113_v41 = vpack.c.bf16 %v3097_v44, %v3097_v44 }
 0x398   : > { %3130 = vst.msk [vmem:[%s4810_s30 + $0x24] sm:$0xf] %vm3120_vm2, %v3113_v41 }
 0x39a   : > { %v3029_v28 = vpop.f32.mrf.mxu2 }
 0x39b   : > { %v3051_v34 = vmul.f32 %v4778_v46, %v3029_v28 }
 0x39d   : > { %v2844_v59 = vpop.f32.mrf.mxu1  ;;  %v3071_v25 = vadd.f32 %v4789_v37, %v3051_v34 }
 0x39e   : > { %v2873_v10 = vmul.f32 %v4783_v62, %v2844_v59 }
 0x3a0   : > { %v2893_v51 = vadd.f32 %v4795_v39, %v2873_v10 }
 0x3a2   : > { %v3082_v58 = vadd.f32 %v3066_v40, %v2893_v51 }
 0x3a4   : > { %v3098_v60 = vmax.f32 %v3082_v58, 0.0 }
 0x3a5   : > { %v2846_v6 = vpop.f32.mrf.mxu1 }
 0x3a6   : > { %v3114_v7 = vpack.c.bf16 %v3098_v60, %v3098_v60  ;;  %v2874_v9 = vmul.f32 %v4783_v62, %v2846_v6 }
 0x3a8   : > { %3131 = vst.msk [vmem:[%s4810_s30 + $0x28] sm:$0xf] %vm3120_vm2, %v3114_v7  ;;  %v2894_v36 = vadd.f32 %v4795_v39, %v2874_v9 }
 0x3aa   : > { %v3083_v23 = vadd.f32 %v3067_v11, %v2894_v36 }
 0x3ac   : > { %v3099_v50 = vmax.f32 %v3083_v23, 0.0 }
 0x3ae   : > { %v3115_v30 = vpack.c.bf16 %v3099_v50, %v3099_v50 }
 0x3b0   : > { %3132 = vst.msk [vmem:[%s4810_s30 + $0x2c] sm:$0xf] %vm3120_vm2, %v3115_v30 }
 0x3b5   : > { %v2849_v5 = vpop.f32.mrf.mxu1 }
 0x3b6   : > { %v2875_v8 = vmul.f32 %v4783_v62, %v2849_v5 }
 0x3b8   : > { %v2895_v16 = vadd.f32 %v4795_v39, %v2875_v8 }
 0x3ba   : > { %v3084_v55 = vadd.f32 %v3068_v24, %v2895_v16 }
 0x3bc   : > { %v3100_v61 = vmax.f32 %v3084_v55, 0.0 }
 0x3bd   : > { %v2851_v33 = vpop.f32.mrf.mxu1 }
 0x3be   : > { %v3116_v38 = vpack.c.bf16 %v3100_v61, %v3100_v61  ;;  %v2876_v4 = vmul.f32 %v4783_v62, %v2851_v33 }
 0x3c0   : > { %3133 = vst.msk [vmem:[%s4810_s30 + $0x30] sm:$0xf] %vm3120_vm2, %v3116_v38  ;;  %v2896_v27 = vadd.f32 %v4795_v39, %v2876_v4 }
 0x3c2   : > { %v3085_v48 = vadd.f32 %v3069_v45, %v2896_v27 }
 0x3c4   : > { %v3101_v21 = vmax.f32 %v3085_v48, 0.0 }
 0x3c6   : > { %v3117_v0 = vpack.c.bf16 %v3101_v21, %v3101_v21 }
 0x3c8   : > { %3134 = vst.msk [vmem:[%s4810_s30 + $0x34] sm:$0xf] %vm3120_vm2, %v3117_v0 }
 0x3cd   : > { %v2854_v18 = vpop.f32.mrf.mxu1 }
 0x3ce   : > { %v2877_v29 = vmul.f32 %v4783_v62, %v2854_v18 }
 0x3d0   : > { %v2897_v13 = vadd.f32 %v4795_v39, %v2877_v29 }
 0x3d2   : > { %v3086_v3 = vadd.f32 %v3070_v57, %v2897_v13 }
 0x3d4   : > { %v3102_v26 = vmax.f32 %v3086_v3, 0.0 }
 0x3d5   : > { %v2856_v2 = vpop.f32.mrf.mxu1 }
 0x3d6   : > { %v3118_v19 = vpack.c.bf16 %v3102_v26, %v3102_v26  ;;  %v2878_v54 = vmul.f32 %v4783_v62, %v2856_v2 }
 0x3d8   : > { %3135 = vst.msk [vmem:[%s4810_s30 + $0x38] sm:$0xf] %vm3120_vm2, %v3118_v19  ;;  %v2898_v63 = vadd.f32 %v4795_v39, %v2878_v54 }
 0x3da   : > { %v3087_v42 = vadd.f32 %v3071_v25, %v2898_v63 }
 0x3dc   : > { %v3103_v43 = vmax.f32 %v3087_v42, 0.0 }
 0x3de   : > { %v3119_v31 = vpack.c.bf16 %v3103_v43, %v3103_v43 }
 0x3e0   : > { %3136 = vst.msk [vmem:[%s4810_s30 + $0x3c] sm:$0xf] %vm3120_vm2, %v3119_v31 }
 0x3e1 PF: > { %s26_s22 = sadd.s32 1, %s3959_s22   ;;  %s4954_s19 = sld [smem:[#allocation6_spill]] }
 0x3e2   : > { %p23_p2 = scmp.ge.s32.totalorder %s26_s22, 6   ;;  %s4955_s27 = sld [smem:[#allocation7_spill]] }
 0x3e3   : > { %s4956_s21 = sld [smem:[#allocation8_spill]]  ;;  %s4957_s18 = smov %s3951_s20 }
 0x3e4   :  { %25 = sbr.rel (!%p23_p2) target bundleno = 5 (0x5), region = 123 }
 0x3e8   : > { %s4958_s20 = smov %s4955_s27 }
 0x3e9   :  { %3167 = vsyncpa [#allocation4], 1 }
 0x3ea   :  { %3169 = vsyncpa [#allocation4 + $0x1], 1 }

</bundles_post_ra>
